<compile_context>
chip_gen: v5e
topology: v5e:2x2
jax: 0.10.0
libtpu: 0.0.40
codegen_flags: <defaults>
</compile_context>

<pallas_src>
import jax
import jax.numpy as jnp
from jax import lax
from jax.experimental import pallas as pl
from jax.experimental.pallas import tpu as pltpu


# Operand dtype for the matmuls.  bf16 would halve HBM/VMEM traffic of the
# patch stream and double MXU throughput, but loosens accuracy vs. the f32
# PyTorch reference, so we keep f32 operands (accumulation is f32 either way
# via preferred_element_type).
_COMPUTE_DTYPE = jnp.float32


# ---------------------------------------------------------------------------
# Pallas kernels: one matmul per tile + fused epilogue
# ---------------------------------------------------------------------------
def _conv_bias_relu_kernel(p_ref, w_ref, b_ref, o_ref):
    """o = relu(p @ W + b);  p:(TP,9C)  W:(9C,C)  b:(1,C)  o:(TP,C)."""
    acc = jnp.dot(p_ref[...], w_ref[...], preferred_element_type=jnp.float32)
    o_ref[...] = jnp.maximum(acc + b_ref[...], 0.0).astype(o_ref.dtype)


def _conv_bias_residual_kernel(p_ref, w_ref, b_ref, r_ref, o_ref):
    """o = p @ W + b + residual."""
    acc = jnp.dot(p_ref[...], w_ref[...], preferred_element_type=jnp.float32)
    o_ref[...] = (acc + b_ref[...] + r_ref[...].astype(jnp.float32)).astype(o_ref.dtype)


# ---------------------------------------------------------------------------
# Tile sizing (per TPU generation)
# ---------------------------------------------------------------------------
def _vmem_budget_bytes():
    """Streaming-buffer budget, derived from physical VMEM of this chip."""
    try:
        cap = int(pltpu.get_tpu_info().vmem_capacity_bytes)
    except Exception:
        cap = 64 << 20  # conservative (v7x-sized) fallback
    # Use at most ~3/8 of physical VMEM for this kernel's streamed buffers:
    # 24 MiB on v7x (64 MiB VMEM), 48 MiB on v5e/v6e (128 MiB VMEM).
    return max(8 << 20, min(cap * 3 // 8, 48 << 20))


def _pick_tile_rows(P, C, budget_bytes, bytes_per_elt):
    # Per pixel-row streaming cost: double-buffered (TP, 9C) patch tile plus
    # double-buffered (TP, C) output and residual tiles.
    per_row = (2 * 9 * C + 2 * C + 2 * C) * bytes_per_elt
    tp = budget_bytes // max(per_row, 1)
    tp = int(max(8, min(tp, 4096, P)))
    tp = (tp // 8) * 8          # sublane multiple
    return max(tp, 8)


# ---------------------------------------------------------------------------
# One 3x3 conv (+bias, +relu or +residual) as a gridded pallas_call
# ---------------------------------------------------------------------------
def _conv3x3_pallas(patches, w_k, b_row, residual=None):
    P, K = patches.shape                    # K = 9*C
    C = w_k.shape[1]

    budget = _vmem_budget_bytes()
    tp = _pick_tile_rows(P, C, budget, patches.dtype.itemsize)
    num_tiles = -(-P // tp)
    P_pad = num_tiles * tp
    if P_pad != P:
        pad = P_pad - P
        patches = jnp.pad(patches, ((0, pad), (0, 0)))
        if residual is not None:
            residual = jnp.pad(residual, ((0, pad), (0, 0)))

    in_specs = [
        pl.BlockSpec((tp, K), lambda i: (i, 0)),      # streamed patch tiles
        pl.BlockSpec((K, C), lambda i: (0, 0)),       # resident weights
        pl.BlockSpec((1, C), lambda i: (0, 0)),       # resident bias
    ]
    operands = [patches, w_k, b_row]
    if residual is None:
        kernel = _conv_bias_relu_kernel
    else:
        kernel = _conv_bias_residual_kernel
        in_specs.append(pl.BlockSpec((tp, C), lambda i: (i, 0)))
        operands.append(residual)

    bytes_accessed = sum(int(a.size) * a.dtype.itemsize for a in operands)
    bytes_accessed += P_pad * C * 4         # output
    cost = pl.CostEstimate(flops=2 * P_pad * K * C,
                           transcendentals=0,
                           bytes_accessed=int(bytes_accessed))

    out = pl.pallas_call(
        kernel,
        out_shape=jax.ShapeDtypeStruct((P_pad, C), jnp.float32),
        grid_spec=pltpu.PrefetchScalarGridSpec(
            num_scalar_prefetch=0,
            grid=(num_tiles,),
            in_specs=in_specs,
            out_specs=pl.BlockSpec((tp, C), lambda i: (i, 0)),
        ),
        compiler_params=pltpu.CompilerParams(
            dimension_semantics=("parallel",),
            vmem_limit_bytes=int(min(budget + (16 << 20), 100 << 20)),
        ),
        cost_estimate=cost,
    )(*operands)

    return out[:P] if P_pad != P else out


# ---------------------------------------------------------------------------
# JAX glue: im2col in the (P, 9C) layout the single-matmul kernel needs
# ---------------------------------------------------------------------------
def _make_patches_9c(x_nhwc):
    """Zero-pad by 1 and lay out the 9 shifted 3x3 taps along channels.

    Returns (N*H*W, 9*C); pure data movement, no arithmetic.  Tap order is
    (dy major, dx minor, c_in fastest) to match the weight reshape below.
    """
    N, H, W, C = x_nhwc.shape
    xp = jnp.pad(x_nhwc, ((0, 0), (1, 1), (1, 1), (0, 0)))
    taps = [xp[:, dy:dy + H, dx:dx + W, :] for dy in range(3) for dx in range(3)]
    return jnp.concatenate(taps, axis=-1).reshape(N * H * W, 9 * C)


def residual_block(x_nchw, w1, b1, w2, b2):
    """Forward pass of ResidualBlock.

    x_nchw: (N, C, H, W) float32   (PyTorch convention)
    w1, w2: (C, C, 3, 3) float32   (PyTorch OIHW conv weights)
    b1, b2: (C,)         float32
    returns (N, C, H, W) float32
    """
    N, C, H, W = x_nchw.shape
    P = N * H * W

    x = jnp.transpose(x_nchw, (0, 2, 3, 1)).astype(jnp.float32)           # NHWC
    # OIHW -> (ky, kx, C_in, C_out) -> (9*C_in, C_out): rows ordered
    # (ky major, kx, c_in fastest) == patch column order above.
    w1_k = jnp.transpose(w1, (2, 3, 1, 0)).reshape(9 * C, C).astype(_COMPUTE_DTYPE)
    w2_k = jnp.transpose(w2, (2, 3, 1, 0)).reshape(9 * C, C).astype(_COMPUTE_DTYPE)
    b1_r = b1.reshape(1, C).astype(jnp.float32)
    b2_r = b2.reshape(1, C).astype(jnp.float32)

    x_flat = x.reshape(P, C)

    # conv1 + bias + ReLU
    p1 = _make_patches_9c(x).astype(_COMPUTE_DTYPE)                       # (P, 9C)
    h = _conv3x3_pallas(p1, w1_k, b1_r)                                   # (P, C)

    # conv2 + bias + residual add
    p2 = _make_patches_9c(h.reshape(N, H, W, C)).astype(_COMPUTE_DTYPE)   # (P, 9C)
    out = _conv3x3_pallas(p2, w2_k, b2_r, residual=x_flat)                # (P, C)

    return jnp.transpose(out.reshape(N, H, W, C), (0, 3, 1, 2))           # NCHW


# ---------------------------------------------------------------------------
# Reference (plain JAX) for validation
# ---------------------------------------------------------------------------
def _reference(x, w1, b1, w2, b2):
    dn = ("NCHW", "OIHW", "NCHW")
    h = lax.conv_general_dilated(x, w1, (1, 1), ((1, 1), (1, 1)),
                                 dimension_numbers=dn)
    h = jnp.maximum(h + b1[None, :, None, None], 0.0)
    o = lax.conv_general_dilated(h, w2, (1, 1), ((1, 1), (1, 1)),
                                 dimension_numbers=dn)
    return o + b2[None, :, None, None] + x


if __name__ == "__main__":
    key = jax.random.PRNGKey(0)
    k_x, k_w1, k_b1, k_w2, k_b2 = jax.random.split(key, 5)

    N, C, H, W = 2, 4, 16, 16
    x = jax.random.normal(k_x, (N, C, H, W), jnp.float32)
    # Deterministic synthetic parameters (shapes from nn.Conv2d(C, C, 3, padding=1))
    w1 = jax.random.normal(k_w1, (C, C, 3, 3), jnp.float32) * 0.1
    b1 = jax.random.normal(k_b1, (C,), jnp.float32) * 0.1
    w2 = jax.random.normal(k_w2, (C, C, 3, 3), jnp.float32) * 0.1
    b2 = jax.random.normal(k_b2, (C,), jnp.float32) * 0.1

    out = jax.jit(residual_block)(x, w1, b1, w2, b2)
    out = jax.block_until_ready(out)

    expected = _reference(x, w1, b1, w2, b2)
    assert out.shape == (N, C, H, W) and out.dtype == jnp.float32
    assert jnp.allclose(out, expected, atol=1e-4, rtol=1e-4), (
        float(jnp.max(jnp.abs(out - expected))))

    print("KERNEL_OK")
</pallas_src>

<mosaic_0001>
module attributes {stable_mosaic.version = 11 : i64} {
  func.func @_conv_bias_relu_kernel(%arg0: i32, %arg1: memref<512x36xf32, #tpu.memory_space<vmem>>, %arg2: memref<36x4xf32, #tpu.memory_space<vmem>>, %arg3: memref<1x4xf32, #tpu.memory_space<vmem>>, %arg4: memref<512x4xf32, #tpu.memory_space<vmem>>) attributes {dimension_semantics = [#tpu.dimension_semantics<parallel>], iteration_bounds = array<i64: 1>, scalar_prefetch = 0 : i64, scratch_operands = 0 : i64, tpu.core_type = #tpu.core_type<tc>, window_params = [{transform_indices = @transform_0, window_bounds = array<i64: 512, 36>}, {pipeline_mode = #tpu.pipeline_mode<synchronous>, transform_indices = @transform_1, window_bounds = array<i64: 36, 4>}, {pipeline_mode = #tpu.pipeline_mode<synchronous>, transform_indices = @transform_2, window_bounds = array<i64: 1, 4>}, {transform_indices = @transform_3, window_bounds = array<i64: 512, 4>}]} {
    %c0 = arith.constant 0 : index
    %c0_0 = arith.constant 0 : index
    %0 = vector.load %arg1[%c0, %c0_0] : memref<512x36xf32, #tpu.memory_space<vmem>>, vector<512x36xf32>
    %c0_1 = arith.constant 0 : index
    %c0_2 = arith.constant 0 : index
    %1 = vector.load %arg2[%c0_1, %c0_2] : memref<36x4xf32, #tpu.memory_space<vmem>>, vector<36x4xf32>
    %cst = arith.constant dense<0.000000e+00> : vector<512x4xf32>
    %2 = tpu.matmul %0, %1, %cst {dimension_numbers = #tpu.dot_dimension_numbers<[1], [0], [0], [1], [0, 0, 1, 1], [], []>} : vector<512x36xf32>, vector<36x4xf32>, vector<512x4xf32> -> vector<512x4xf32>
    %c0_3 = arith.constant 0 : index
    %c0_4 = arith.constant 0 : index
    %3 = vector.load %arg3[%c0_3, %c0_4] : memref<1x4xf32, #tpu.memory_space<vmem>>, vector<1x4xf32>
    %4 = vector.broadcast %3 : vector<1x4xf32> to vector<512x4xf32>
    %5 = arith.addf %2, %4 : vector<512x4xf32>
    %cst_5 = arith.constant 0.000000e+00 : f32
    %6 = vector.broadcast %cst_5 : f32 to vector<512x4xf32>
    %7 = arith.maximumf %5, %6 : vector<512x4xf32>
    %c0_6 = arith.constant 0 : index
    %c0_7 = arith.constant 0 : index
    %8 = vector.load %arg4[%c0_6, %c0_7] : memref<512x4xf32, #tpu.memory_space<vmem>>, vector<512x4xf32>
    tpu.vector_store %arg4[%c0_6, %c0_7], %7 {strides = array<i32>} : memref<512x4xf32, #tpu.memory_space<vmem>>, vector<512x4xf32>,
    return
  }
  func.func @transform_0(%arg0: i32) -> (i32, i32) {
    %c0_i32 = arith.constant 0 : i32
    %c0_i32_0 = arith.constant 0 : i32
    return %arg0, %c0_i32 : i32, i32
  }
  func.func @transform_1(%arg0: i32) -> (i32, i32) {
    %c0_i32 = arith.constant 0 : i32
    %c0_i32_0 = arith.constant 0 : i32
    %c0_i32_1 = arith.constant 0 : i32
    return %c0_i32, %c0_i32_0 : i32, i32
  }
  func.func @transform_2(%arg0: i32) -> (i32, i32) {
    %c0_i32 = arith.constant 0 : i32
    %c0_i32_0 = arith.constant 0 : i32
    %c0_i32_1 = arith.constant 0 : i32
    return %c0_i32, %c0_i32_0 : i32, i32
  }
  func.func @transform_3(%arg0: i32) -> (i32, i32) {
    %c0_i32 = arith.constant 0 : i32
    %c0_i32_0 = arith.constant 0 : i32
    return %arg0, %c0_i32 : i32, i32
  }
}

module attributes {stable_mosaic.version = 11 : i64} {
  func.func @_conv_bias_residual_kernel(%arg0: i32, %arg1: memref<512x36xf32, #tpu.memory_space<vmem>>, %arg2: memref<36x4xf32, #tpu.memory_space<vmem>>, %arg3: memref<1x4xf32, #tpu.memory_space<vmem>>, %arg4: memref<512x4xf32, #tpu.memory_space<vmem>>, %arg5: memref<512x4xf32, #tpu.memory_space<vmem>>) attributes {dimension_semantics = [#tpu.dimension_semantics<parallel>], iteration_bounds = array<i64: 1>, scalar_prefetch = 0 : i64, scratch_operands = 0 : i64, tpu.core_type = #tpu.core_type<tc>, window_params = [{transform_indices = @transform_0, window_bounds = array<i64: 512, 36>}, {pipeline_mode = #tpu.pipeline_mode<synchronous>, transform_indices = @transform_1, window_bounds = array<i64: 36, 4>}, {pipeline_mode = #tpu.pipeline_mode<synchronous>, transform_indices = @transform_2, window_bounds = array<i64: 1, 4>}, {transform_indices = @transform_3, window_bounds = array<i64: 512, 4>}, {transform_indices = @transform_4, window_bounds = array<i64: 512, 4>}]} {
    %c0 = arith.constant 0 : index
    %c0_0 = arith.constant 0 : index
    %0 = vector.load %arg1[%c0, %c0_0] : memref<512x36xf32, #tpu.memory_space<vmem>>, vector<512x36xf32>
    %c0_1 = arith.constant 0 : index
    %c0_2 = arith.constant 0 : index
    %1 = vector.load %arg2[%c0_1, %c0_2] : memref<36x4xf32, #tpu.memory_space<vmem>>, vector<36x4xf32>
    %cst = arith.constant dense<0.000000e+00> : vector<512x4xf32>
    %2 = tpu.matmul %0, %1, %cst {dimension_numbers = #tpu.dot_dimension_numbers<[1], [0], [0], [1], [0, 0, 1, 1], [], []>} : vector<512x36xf32>, vector<36x4xf32>, vector<512x4xf32> -> vector<512x4xf32>
    %c0_3 = arith.constant 0 : index
    %c0_4 = arith.constant 0 : index
    %3 = vector.load %arg3[%c0_3, %c0_4] : memref<1x4xf32, #tpu.memory_space<vmem>>, vector<1x4xf32>
    %4 = vector.broadcast %3 : vector<1x4xf32> to vector<512x4xf32>
    %5 = arith.addf %2, %4 : vector<512x4xf32>
    %c0_5 = arith.constant 0 : index
    %c0_6 = arith.constant 0 : index
    %6 = vector.load %arg4[%c0_5, %c0_6] : memref<512x4xf32, #tpu.memory_space<vmem>>, vector<512x4xf32>
    %7 = arith.addf %5, %6 : vector<512x4xf32>
    %c0_7 = arith.constant 0 : index
    %c0_8 = arith.constant 0 : index
    %8 = vector.load %arg5[%c0_7, %c0_8] : memref<512x4xf32, #tpu.memory_space<vmem>>, vector<512x4xf32>
    tpu.vector_store %arg5[%c0_7, %c0_8], %7 {strides = array<i32>} : memref<512x4xf32, #tpu.memory_space<vmem>>, vector<512x4xf32>,
    return
  }
  func.func @transform_0(%arg0: i32) -> (i32, i32) {
    %c0_i32 = arith.constant 0 : i32
    %c0_i32_0 = arith.constant 0 : i32
    return %arg0, %c0_i32 : i32, i32
  }
  func.func @transform_1(%arg0: i32) -> (i32, i32) {
    %c0_i32 = arith.constant 0 : i32
    %c0_i32_0 = arith.constant 0 : i32
    %c0_i32_1 = arith.constant 0 : i32
    return %c0_i32, %c0_i32_0 : i32, i32
  }
  func.func @transform_2(%arg0: i32) -> (i32, i32) {
    %c0_i32 = arith.constant 0 : i32
    %c0_i32_0 = arith.constant 0 : i32
    %c0_i32_1 = arith.constant 0 : i32
    return %c0_i32, %c0_i32_0 : i32, i32
  }
  func.func @transform_3(%arg0: i32) -> (i32, i32) {
    %c0_i32 = arith.constant 0 : i32
    %c0_i32_0 = arith.constant 0 : i32
    return %arg0, %c0_i32 : i32, i32
  }
  func.func @transform_4(%arg0: i32) -> (i32, i32) {
    %c0_i32 = arith.constant 0 : i32
    %c0_i32_0 = arith.constant 0 : i32
    return %arg0, %c0_i32 : i32, i32
  }
}

</mosaic_0001>

<bundles_post_ra>
// kernel: residual_block.2
= control target key start
LH: loop header
LB: loop body
LE: loop exit
PB: predicated region body
PF: predicated region fallthrough
CT: control target
= control target key end

     0   :  { %vm280_vm0 = vcmask 1043456   ;;  %vm87_vm1 = vcmask 293888   ;;  %vm557_vm2 = vcmask 31744   ;;  %s1323_s1 = inlined_call_operand.vmem [shape: f32[36,4], index: 1, kind: input, shape index: {}]   ;;  %s1324_s0 = inlined_call_operand.vmem [shape: f32[512,36], index: 0, kind: input, shape index: {}]   ;;  %s1325_s2 = inlined_call_operand.vmem [shape: f32[1,4], index: 2, kind: input, shape index: {}]   ;;  %s1326_s3 = inlined_call_operand.vmem [shape: f32[512,4], index: 3, kind: output, shape index: {}]  }
   0x1   :  { %v82_v0 = vld [vmem:[%s1323_s1 + $0x20] sm:$0xf]  ;;  %v81_v1 = vld [vmem:[%s1323_s1 + $0x18] sm:$0xff]  ;;  %v80_v2 = vld [vmem:[%s1323_s1 + $0x10] sm:$0xff] }
   0x2   :  { %692 = vmatpush.msk.msra.mxu2 %vm280_vm0, %v82_v0  ;;  %693 = vmatpush.msk.msra.mxu3 %vm280_vm0, %v82_v0  ;;  %v79_v3 = vld [vmem:[%s1323_s1 + $0x8] sm:$0xff]  ;;  %v78_v4 = vld [vmem:[%s1323_s1] sm:$0xff]  ;;  %v48_v13 = vld [vmem:[%s1324_s0 + $0x110] sm:$0xff] }
   0x3   :  { %626 = vmatpush.msk.msra.mxu0 %vm280_vm0, %v82_v0  ;;  %691 = vmatpush.msk.msra.mxu1 %vm280_vm0, %v82_v0  ;;  %v46_v5 = vld [vmem:[%s1324_s0 + $0x100] sm:$0xff]  ;;  %v47_v9 = vld [vmem:[%s1324_s0 + $0x108] sm:$0xff]  ;;  %v64_v14 = vld [vmem:[%s1324_s0 + $0x190] sm:$0xff] }
   0x4   :  { %695 = vmatpush.msra.mxu2 %v81_v1  ;;  %696 = vmatpush.msra.mxu3 %v81_v1  ;;  %v62_v6 = vld [vmem:[%s1324_s0 + $0x180] sm:$0xff]  ;;  %v63_v10 = vld [vmem:[%s1324_s0 + $0x188] sm:$0xff]  ;;  %v16_v15 = vld [vmem:[%s1324_s0 + $0x10] sm:$0xff] }
   0x5   :  { %296 = vmatpush.msra.mxu0 %v81_v1  ;;  %694 = vmatpush.msra.mxu1 %v81_v1  ;;  %v14_v7 = vld [vmem:[%s1324_s0] sm:$0xff]  ;;  %v15_v11 = vld [vmem:[%s1324_s0 + $0x8] sm:$0xff]  ;;  %v32_v16 = vld [vmem:[%s1324_s0 + $0x90] sm:$0xff] }
   0x6   :  { %698 = vmatpush.msra.mxu2 %v80_v2  ;;  %699 = vmatpush.msra.mxu3 %v80_v2  ;;  %v30_v8 = vld [vmem:[%s1324_s0 + $0x80] sm:$0xff]  ;;  %v31_v12 = vld [vmem:[%s1324_s0 + $0x88] sm:$0xff]  ;;  %v49_v17 = vld [vmem:[%s1324_s0 + $0x118] sm:$0xff] }
   0x7   :  { %297 = vmatpush.msra.mxu0 %v80_v2  ;;  %697 = vmatpush.msra.mxu1 %v80_v2  ;;  %v65_v18 = vld [vmem:[%s1324_s0 + $0x198] sm:$0xff]  ;;  %v50_v21 = vld [vmem:[%s1324_s0 + $0x120] sm:$0xff]  ;;  %v51_v25 = vld [vmem:[%s1324_s0 + $0x128] sm:$0xff] }
   0x8   :  { %701 = vmatpush.msra.mxu2 %v79_v3  ;;  %702 = vmatpush.msra.mxu3 %v79_v3  ;;  %v17_v19 = vld [vmem:[%s1324_s0 + $0x18] sm:$0xff]  ;;  %v66_v22 = vld [vmem:[%s1324_s0 + $0x1a0] sm:$0xff]  ;;  %v67_v26 = vld [vmem:[%s1324_s0 + $0x1a8] sm:$0xff] }
   0x9   :  { %298 = vmatpush.msra.mxu0 %v79_v3  ;;  %700 = vmatpush.msra.mxu1 %v79_v3  ;;  %v33_v20 = vld [vmem:[%s1324_s0 + $0x98] sm:$0xff]  ;;  %v18_v23 = vld [vmem:[%s1324_s0 + $0x20] sm:$0xff]  ;;  %v19_v27 = vld [vmem:[%s1324_s0 + $0x28] sm:$0xff] }
   0xa   :  { %704 = vmatpush.msra.mxu2 %v78_v4  ;;  %705 = vmatpush.msra.mxu3 %v78_v4  ;;  %v34_v24 = vld [vmem:[%s1324_s0 + $0xa0] sm:$0xff]  ;;  %v35_v28 = vld [vmem:[%s1324_s0 + $0xa8] sm:$0xff]  ;;  %v52_v29 = vld [vmem:[%s1324_s0 + $0x130] sm:$0xff] }
   0xb   :  { %659 = vmatmul.msk.f32.vlgmr.msra.gmra.mxu2 %vm87_vm1, %v46_v5  ;;  %675 = vmatmul.msk.f32.vlgmr.msra.gmra.mxu3 %vm87_vm1, %v62_v6  ;;  %v68_v30 = vld [vmem:[%s1324_s0 + $0x1b0] sm:$0xff]  ;;  %v53_v33 = vld [vmem:[%s1324_s0 + $0x138] sm:$0xff]  ;;  %v54_v37 = vld [vmem:[%s1324_s0 + $0x140] sm:$0xff] }
   0xc   :  { %299 = vmatpush.msra.mxu0 %v78_v4  ;;  %703 = vmatpush.msra.mxu1 %v78_v4  ;;  %v20_v31 = vld [vmem:[%s1324_s0 + $0x30] sm:$0xff]  ;;  %v69_v34 = vld [vmem:[%s1324_s0 + $0x1b8] sm:$0xff]  ;;  %v70_v38 = vld [vmem:[%s1324_s0 + $0x1c0] sm:$0xff] }
   0xd   :  { %627 = vmatmul.msk.f32.vlgmr.msra.gmra.mxu0 %vm87_vm1, %v14_v7  ;;  %643 = vmatmul.msk.f32.vlgmr.msra.gmra.mxu1 %vm87_vm1, %v30_v8  ;;  %v36_v32 = vld [vmem:[%s1324_s0 + $0xb0] sm:$0xff]  ;;  %v21_v35 = vld [vmem:[%s1324_s0 + $0x38] sm:$0xff]  ;;  %v22_v39 = vld [vmem:[%s1324_s0 + $0x40] sm:$0xff] }
   0xe   :  { %v37_v36 = vld [vmem:[%s1324_s0 + $0xb8] sm:$0xff]  ;;  %v38_v40 = vld [vmem:[%s1324_s0 + $0xc0] sm:$0xff]  ;;  %v55_v41 = vld [vmem:[%s1324_s0 + $0x148] sm:$0xff] }
   0xf   :  { %v71_v42 = vld [vmem:[%s1324_s0 + $0x1c8] sm:$0xff]  ;;  %v56_v45 = vld [vmem:[%s1324_s0 + $0x150] sm:$0xff]  ;;  %v57_v49 = vld [vmem:[%s1324_s0 + $0x158] sm:$0xff] }
  0x10   :  { %v23_v43 = vld [vmem:[%s1324_s0 + $0x48] sm:$0xff]  ;;  %v72_v46 = vld [vmem:[%s1324_s0 + $0x1d0] sm:$0xff]  ;;  %v73_v50 = vld [vmem:[%s1324_s0 + $0x1d8] sm:$0xff] }
  0x11   :  { %v39_v44 = vld [vmem:[%s1324_s0 + $0xc8] sm:$0xff]  ;;  %v24_v47 = vld [vmem:[%s1324_s0 + $0x50] sm:$0xff]  ;;  %v25_v51 = vld [vmem:[%s1324_s0 + $0x58] sm:$0xff] }
  0x12   :  { %v40_v48 = vld [vmem:[%s1324_s0 + $0xd0] sm:$0xff]  ;;  %v41_v52 = vld [vmem:[%s1324_s0 + $0xd8] sm:$0xff]  ;;  %v58_v53 = vld [vmem:[%s1324_s0 + $0x160] sm:$0xff] }
  0x13   :  { %660 = vmatmul.msk.f32.gmra.mxu2 %vm87_vm1, %v47_v9  ;;  %676 = vmatmul.msk.f32.gmra.mxu3 %vm87_vm1, %v63_v10  ;;  %v74_v54 = vld [vmem:[%s1324_s0 + $0x1e0] sm:$0xff]  ;;  %v59_v57 = vld [vmem:[%s1324_s0 + $0x168] sm:$0xff]  ;;  %v60_v61 = vld [vmem:[%s1324_s0 + $0x170] sm:$0xff] }
  0x14   :  { %v26_v55 = vld [vmem:[%s1324_s0 + $0x60] sm:$0xff]  ;;  %v75_v58 = vld [vmem:[%s1324_s0 + $0x1e8] sm:$0xff]  ;;  %v76_v62 = vld [vmem:[%s1324_s0 + $0x1f0] sm:$0xff] }
  0x15   :  { %628 = vmatmul.msk.f32.gmra.mxu0 %vm87_vm1, %v15_v11  ;;  %644 = vmatmul.msk.f32.gmra.mxu1 %vm87_vm1, %v31_v12  ;;  %v42_v56 = vld [vmem:[%s1324_s0 + $0xe0] sm:$0xff]  ;;  %v27_v59 = vld [vmem:[%s1324_s0 + $0x68] sm:$0xff]  ;;  %v28_v63 = vld [vmem:[%s1324_s0 + $0x70] sm:$0xff] }
  0x16   :  { %v43_v60 = vld [vmem:[%s1324_s0 + $0xe8] sm:$0xff]  ;;  %v44_v0 = vld [vmem:[%s1324_s0 + $0xf0] sm:$0xff]  ;;  %v61_v1 = vld [vmem:[%s1324_s0 + $0x178] sm:$0xff] }
  0x17   :  { %v77_v2 = vld [vmem:[%s1324_s0 + $0x1f8] sm:$0xff]  ;;  %v1001_v5 = vld [vmem:[%s1325_s2] ss:$0 sm:$0xff] }
  0x18   :  { %v29_v3 = vld [vmem:[%s1324_s0 + $0x78] sm:$0xff] }
  0x19   :  { %v45_v4 = vld [vmem:[%s1324_s0 + $0xf8] sm:$0xff] }
  0x1b   :  { %661 = vmatmul.msk.f32.gmra.mxu2 %vm87_vm1, %v48_v13  ;;  %677 = vmatmul.msk.f32.gmra.mxu3 %vm87_vm1, %v64_v14 }
  0x1d   :  { %629 = vmatmul.msk.f32.gmra.mxu0 %vm87_vm1, %v16_v15  ;;  %645 = vmatmul.msk.f32.gmra.mxu1 %vm87_vm1, %v32_v16 }
  0x23   :  { %662 = vmatmul.msk.f32.gmra.mxu2 %vm87_vm1, %v49_v17  ;;  %678 = vmatmul.msk.f32.gmra.mxu3 %vm87_vm1, %v65_v18 }
  0x25   :  { %630 = vmatmul.msk.f32.gmra.mxu0 %vm87_vm1, %v17_v19  ;;  %646 = vmatmul.msk.f32.gmra.mxu1 %vm87_vm1, %v33_v20 }
  0x2b   :  { %663 = vmatmul.msk.f32.gmra.mxu2 %vm87_vm1, %v50_v21  ;;  %679 = vmatmul.msk.f32.gmra.mxu3 %vm87_vm1, %v66_v22 }
  0x2d   :  { %631 = vmatmul.msk.f32.gmra.mxu0 %vm87_vm1, %v18_v23  ;;  %647 = vmatmul.msk.f32.gmra.mxu1 %vm87_vm1, %v34_v24 }
  0x33   :  { %664 = vmatmul.msk.f32.gmra.mxu2 %vm87_vm1, %v51_v25  ;;  %680 = vmatmul.msk.f32.gmra.mxu3 %vm87_vm1, %v67_v26 }
  0x35   :  { %632 = vmatmul.msk.f32.gmra.mxu0 %vm87_vm1, %v19_v27  ;;  %648 = vmatmul.msk.f32.gmra.mxu1 %vm87_vm1, %v35_v28 }
  0x3b   :  { %665 = vmatmul.msk.f32.gmra.mxu2 %vm87_vm1, %v52_v29  ;;  %681 = vmatmul.msk.f32.gmra.mxu3 %vm87_vm1, %v68_v30 }
  0x3d   :  { %633 = vmatmul.msk.f32.gmra.mxu0 %vm87_vm1, %v20_v31  ;;  %649 = vmatmul.msk.f32.gmra.mxu1 %vm87_vm1, %v36_v32 }
  0x43   :  { %666 = vmatmul.msk.f32.gmra.mxu2 %vm87_vm1, %v53_v33  ;;  %682 = vmatmul.msk.f32.gmra.mxu3 %vm87_vm1, %v69_v34 }
  0x45   :  { %634 = vmatmul.msk.f32.gmra.mxu0 %vm87_vm1, %v21_v35  ;;  %650 = vmatmul.msk.f32.gmra.mxu1 %vm87_vm1, %v37_v36 }
  0x4b   :  { %667 = vmatmul.msk.f32.gmra.mxu2 %vm87_vm1, %v54_v37  ;;  %683 = vmatmul.msk.f32.gmra.mxu3 %vm87_vm1, %v70_v38 }
  0x4d   :  { %635 = vmatmul.msk.f32.gmra.mxu0 %vm87_vm1, %v22_v39  ;;  %651 = vmatmul.msk.f32.gmra.mxu1 %vm87_vm1, %v38_v40 }
  0x53   :  { %668 = vmatmul.msk.f32.gmra.mxu2 %vm87_vm1, %v55_v41  ;;  %684 = vmatmul.msk.f32.gmra.mxu3 %vm87_vm1, %v71_v42 }
  0x55   :  { %636 = vmatmul.msk.f32.gmra.mxu0 %vm87_vm1, %v23_v43  ;;  %652 = vmatmul.msk.f32.gmra.mxu1 %vm87_vm1, %v39_v44 }
  0x5b   :  { %669 = vmatmul.msk.f32.gmra.mxu2 %vm87_vm1, %v56_v45  ;;  %685 = vmatmul.msk.f32.gmra.mxu3 %vm87_vm1, %v72_v46 }
  0x5d   :  { %637 = vmatmul.msk.f32.gmra.mxu0 %vm87_vm1, %v24_v47  ;;  %653 = vmatmul.msk.f32.gmra.mxu1 %vm87_vm1, %v40_v48 }
  0x63   :  { %670 = vmatmul.msk.f32.gmra.mxu2 %vm87_vm1, %v57_v49  ;;  %686 = vmatmul.msk.f32.gmra.mxu3 %vm87_vm1, %v73_v50 }
  0x65   :  { %638 = vmatmul.msk.f32.gmra.mxu0 %vm87_vm1, %v25_v51  ;;  %654 = vmatmul.msk.f32.gmra.mxu1 %vm87_vm1, %v41_v52 }
  0x6b   :  { %671 = vmatmul.msk.f32.gmra.mxu2 %vm87_vm1, %v58_v53  ;;  %687 = vmatmul.msk.f32.gmra.mxu3 %vm87_vm1, %v74_v54 }
  0x6d   :  { %639 = vmatmul.msk.f32.gmra.mxu0 %vm87_vm1, %v26_v55  ;;  %655 = vmatmul.msk.f32.gmra.mxu1 %vm87_vm1, %v42_v56 }
  0x73   :  { %672 = vmatmul.msk.f32.gmra.mxu2 %vm87_vm1, %v59_v57  ;;  %688 = vmatmul.msk.f32.gmra.mxu3 %vm87_vm1, %v75_v58 }
  0x75   :  { %640 = vmatmul.msk.f32.gmra.mxu0 %vm87_vm1, %v27_v59  ;;  %656 = vmatmul.msk.f32.gmra.mxu1 %vm87_vm1, %v43_v60 }
  0x7b   :  { %673 = vmatmul.msk.f32.gmra.mxu2 %vm87_vm1, %v60_v61  ;;  %689 = vmatmul.msk.f32.gmra.mxu3 %vm87_vm1, %v76_v62 }
  0x7d   :  { %641 = vmatmul.msk.f32.gmra.mxu0 %vm87_vm1, %v28_v63  ;;  %657 = vmatmul.msk.f32.gmra.mxu1 %vm87_vm1, %v44_v0 }
  0x83   :  { %674 = vmatmul.msk.f32.gmra.mxu2 %vm87_vm1, %v61_v1  ;;  %690 = vmatmul.msk.f32.gmra.mxu3 %vm87_vm1, %v77_v2 }
  0x85   :  { %642 = vmatmul.msk.f32.gmra.mxu0 %vm87_vm1, %v29_v3  ;;  %658 = vmatmul.msk.f32.gmra.mxu1 %vm87_vm1, %v45_v4 }
  0x8a   :  { %v301_v6 = vpop.f32.mrf.mxu0  ;;  %v349_v7 = vpop.f32.mrf.mxu1 }
  0x8b   :  { %v302_v8 = vadd.f32 %v1001_v5, %v301_v6  ;;  %v350_v9 = vadd.f32 %v1001_v5, %v349_v7 }
  0x8d   :  { %v493_v10 = vmax.f32 %v302_v8, 0.0  ;;  %v509_v11 = vmax.f32 %v350_v9, 0.0 }
  0x8e   :  { %v397_v12 = vpop.f32.mrf.mxu2  ;;  %v445_v13 = vpop.f32.mrf.mxu3 }
  0x8f   :  { %558 = vst.msk [vmem:[%s1326_s3] sm:$0xff] %vm557_vm2, %v493_v10  ;;  %v398_v14 = vadd.f32 %v1001_v5, %v397_v12  ;;  %v446_v15 = vadd.f32 %v1001_v5, %v445_v13 }
  0x90   :  { %574 = vst.msk [vmem:[%s1326_s3 + $0x80] sm:$0xff] %vm557_vm2, %v509_v11 }
  0x91   :  { %v525_v16 = vmax.f32 %v398_v14, 0.0  ;;  %v541_v17 = vmax.f32 %v446_v15, 0.0 }
  0x92   :  { %v304_v18 = vpop.f32.mrf.mxu0  ;;  %v352_v19 = vpop.f32.mrf.mxu1 }
  0x93   :  { %590 = vst.msk [vmem:[%s1326_s3 + $0x100] sm:$0xff] %vm557_vm2, %v525_v16  ;;  %v305_v20 = vadd.f32 %v1001_v5, %v304_v18  ;;  %v353_v21 = vadd.f32 %v1001_v5, %v352_v19 }
  0x94   :  { %606 = vst.msk [vmem:[%s1326_s3 + $0x180] sm:$0xff] %vm557_vm2, %v541_v17 }
  0x95   :  { %v494_v22 = vmax.f32 %v305_v20, 0.0  ;;  %v510_v23 = vmax.f32 %v353_v21, 0.0 }
  0x96   :  { %v400_v24 = vpop.f32.mrf.mxu2  ;;  %v448_v25 = vpop.f32.mrf.mxu3 }
  0x97   :  { %559 = vst.msk [vmem:[%s1326_s3 + $0x8] sm:$0xff] %vm557_vm2, %v494_v22  ;;  %v401_v26 = vadd.f32 %v1001_v5, %v400_v24  ;;  %v449_v27 = vadd.f32 %v1001_v5, %v448_v25 }
  0x98   :  { %575 = vst.msk [vmem:[%s1326_s3 + $0x88] sm:$0xff] %vm557_vm2, %v510_v23 }
  0x99   :  { %v526_v28 = vmax.f32 %v401_v26, 0.0  ;;  %v542_v29 = vmax.f32 %v449_v27, 0.0 }
  0x9a   :  { %v307_v30 = vpop.f32.mrf.mxu0  ;;  %v355_v31 = vpop.f32.mrf.mxu1 }
  0x9b   :  { %591 = vst.msk [vmem:[%s1326_s3 + $0x108] sm:$0xff] %vm557_vm2, %v526_v28  ;;  %v308_v32 = vadd.f32 %v1001_v5, %v307_v30  ;;  %v356_v33 = vadd.f32 %v1001_v5, %v355_v31 }
  0x9c   :  { %607 = vst.msk [vmem:[%s1326_s3 + $0x188] sm:$0xff] %vm557_vm2, %v542_v29 }
  0x9d   :  { %v495_v34 = vmax.f32 %v308_v32, 0.0  ;;  %v511_v35 = vmax.f32 %v356_v33, 0.0 }
  0x9e   :  { %v403_v36 = vpop.f32.mrf.mxu2  ;;  %v451_v37 = vpop.f32.mrf.mxu3 }
  0x9f   :  { %560 = vst.msk [vmem:[%s1326_s3 + $0x10] sm:$0xff] %vm557_vm2, %v495_v34  ;;  %v404_v38 = vadd.f32 %v1001_v5, %v403_v36  ;;  %v452_v39 = vadd.f32 %v1001_v5, %v451_v37 }
  0xa0   :  { %576 = vst.msk [vmem:[%s1326_s3 + $0x90] sm:$0xff] %vm557_vm2, %v511_v35 }
  0xa1   :  { %v527_v40 = vmax.f32 %v404_v38, 0.0  ;;  %v543_v41 = vmax.f32 %v452_v39, 0.0 }
  0xa2   :  { %v310_v42 = vpop.f32.mrf.mxu0  ;;  %v358_v43 = vpop.f32.mrf.mxu1 }
  0xa3   :  { %592 = vst.msk [vmem:[%s1326_s3 + $0x110] sm:$0xff] %vm557_vm2, %v527_v40  ;;  %v311_v44 = vadd.f32 %v1001_v5, %v310_v42  ;;  %v359_v45 = vadd.f32 %v1001_v5, %v358_v43 }
  0xa4   :  { %608 = vst.msk [vmem:[%s1326_s3 + $0x190] sm:$0xff] %vm557_vm2, %v543_v41 }
  0xa5   :  { %v496_v46 = vmax.f32 %v311_v44, 0.0  ;;  %v512_v47 = vmax.f32 %v359_v45, 0.0 }
  0xa6   :  { %v406_v48 = vpop.f32.mrf.mxu2  ;;  %v454_v49 = vpop.f32.mrf.mxu3 }
  0xa7   :  { %561 = vst.msk [vmem:[%s1326_s3 + $0x18] sm:$0xff] %vm557_vm2, %v496_v46  ;;  %v407_v50 = vadd.f32 %v1001_v5, %v406_v48  ;;  %v455_v51 = vadd.f32 %v1001_v5, %v454_v49 }
  0xa8   :  { %577 = vst.msk [vmem:[%s1326_s3 + $0x98] sm:$0xff] %vm557_vm2, %v512_v47 }
  0xa9   :  { %v528_v52 = vmax.f32 %v407_v50, 0.0  ;;  %v544_v53 = vmax.f32 %v455_v51, 0.0 }
  0xaa   :  { %v313_v54 = vpop.f32.mrf.mxu0  ;;  %v361_v55 = vpop.f32.mrf.mxu1 }
  0xab   :  { %593 = vst.msk [vmem:[%s1326_s3 + $0x118] sm:$0xff] %vm557_vm2, %v528_v52  ;;  %v314_v56 = vadd.f32 %v1001_v5, %v313_v54  ;;  %v362_v57 = vadd.f32 %v1001_v5, %v361_v55 }
  0xac   :  { %609 = vst.msk [vmem:[%s1326_s3 + $0x198] sm:$0xff] %vm557_vm2, %v544_v53 }
  0xad   :  { %v497_v58 = vmax.f32 %v314_v56, 0.0  ;;  %v513_v59 = vmax.f32 %v362_v57, 0.0 }
  0xae   :  { %v409_v60 = vpop.f32.mrf.mxu2  ;;  %v457_v61 = vpop.f32.mrf.mxu3 }
  0xaf   :  { %562 = vst.msk [vmem:[%s1326_s3 + $0x20] sm:$0xff] %vm557_vm2, %v497_v58  ;;  %v410_v62 = vadd.f32 %v1001_v5, %v409_v60  ;;  %v458_v63 = vadd.f32 %v1001_v5, %v457_v61 }
  0xb0   :  { %578 = vst.msk [vmem:[%s1326_s3 + $0xa0] sm:$0xff] %vm557_vm2, %v513_v59 }
  0xb1   :  { %v529_v0 = vmax.f32 %v410_v62, 0.0  ;;  %v545_v1 = vmax.f32 %v458_v63, 0.0 }
  0xb2   :  { %v316_v2 = vpop.f32.mrf.mxu0  ;;  %v364_v3 = vpop.f32.mrf.mxu1 }
  0xb3   :  { %594 = vst.msk [vmem:[%s1326_s3 + $0x120] sm:$0xff] %vm557_vm2, %v529_v0  ;;  %v317_v4 = vadd.f32 %v1001_v5, %v316_v2  ;;  %v365_v6 = vadd.f32 %v1001_v5, %v364_v3 }
  0xb4   :  { %610 = vst.msk [vmem:[%s1326_s3 + $0x1a0] sm:$0xff] %vm557_vm2, %v545_v1 }
  0xb5   :  { %v498_v7 = vmax.f32 %v317_v4, 0.0  ;;  %v514_v8 = vmax.f32 %v365_v6, 0.0 }
  0xb6   :  { %v412_v9 = vpop.f32.mrf.mxu2  ;;  %v460_v10 = vpop.f32.mrf.mxu3 }
  0xb7   :  { %563 = vst.msk [vmem:[%s1326_s3 + $0x28] sm:$0xff] %vm557_vm2, %v498_v7  ;;  %v413_v11 = vadd.f32 %v1001_v5, %v412_v9  ;;  %v461_v12 = vadd.f32 %v1001_v5, %v460_v10 }
  0xb8   :  { %579 = vst.msk [vmem:[%s1326_s3 + $0xa8] sm:$0xff] %vm557_vm2, %v514_v8 }
  0xb9   :  { %v530_v13 = vmax.f32 %v413_v11, 0.0  ;;  %v546_v14 = vmax.f32 %v461_v12, 0.0 }
  0xba   :  { %v319_v15 = vpop.f32.mrf.mxu0  ;;  %v367_v16 = vpop.f32.mrf.mxu1 }
  0xbb   :  { %595 = vst.msk [vmem:[%s1326_s3 + $0x128] sm:$0xff] %vm557_vm2, %v530_v13  ;;  %v320_v17 = vadd.f32 %v1001_v5, %v319_v15  ;;  %v368_v18 = vadd.f32 %v1001_v5, %v367_v16 }
  0xbc   :  { %611 = vst.msk [vmem:[%s1326_s3 + $0x1a8] sm:$0xff] %vm557_vm2, %v546_v14 }
  0xbd   :  { %v499_v19 = vmax.f32 %v320_v17, 0.0  ;;  %v515_v20 = vmax.f32 %v368_v18, 0.0 }
  0xbe   :  { %v415_v21 = vpop.f32.mrf.mxu2  ;;  %v463_v22 = vpop.f32.mrf.mxu3 }
  0xbf   :  { %564 = vst.msk [vmem:[%s1326_s3 + $0x30] sm:$0xff] %vm557_vm2, %v499_v19  ;;  %v416_v23 = vadd.f32 %v1001_v5, %v415_v21  ;;  %v464_v24 = vadd.f32 %v1001_v5, %v463_v22 }
  0xc0   :  { %580 = vst.msk [vmem:[%s1326_s3 + $0xb0] sm:$0xff] %vm557_vm2, %v515_v20 }
  0xc1   :  { %v531_v25 = vmax.f32 %v416_v23, 0.0  ;;  %v547_v26 = vmax.f32 %v464_v24, 0.0 }
  0xc2   :  { %v322_v27 = vpop.f32.mrf.mxu0  ;;  %v370_v28 = vpop.f32.mrf.mxu1 }
  0xc3   :  { %596 = vst.msk [vmem:[%s1326_s3 + $0x130] sm:$0xff] %vm557_vm2, %v531_v25  ;;  %v323_v29 = vadd.f32 %v1001_v5, %v322_v27  ;;  %v371_v30 = vadd.f32 %v1001_v5, %v370_v28 }
  0xc4   :  { %612 = vst.msk [vmem:[%s1326_s3 + $0x1b0] sm:$0xff] %vm557_vm2, %v547_v26 }
  0xc5   :  { %v500_v31 = vmax.f32 %v323_v29, 0.0  ;;  %v516_v32 = vmax.f32 %v371_v30, 0.0 }
  0xc6   :  { %v418_v33 = vpop.f32.mrf.mxu2  ;;  %v466_v34 = vpop.f32.mrf.mxu3 }
  0xc7   :  { %565 = vst.msk [vmem:[%s1326_s3 + $0x38] sm:$0xff] %vm557_vm2, %v500_v31  ;;  %v419_v35 = vadd.f32 %v1001_v5, %v418_v33  ;;  %v467_v36 = vadd.f32 %v1001_v5, %v466_v34 }
  0xc8   :  { %581 = vst.msk [vmem:[%s1326_s3 + $0xb8] sm:$0xff] %vm557_vm2, %v516_v32 }
  0xc9   :  { %v532_v37 = vmax.f32 %v419_v35, 0.0  ;;  %v548_v38 = vmax.f32 %v467_v36, 0.0 }
  0xca   :  { %v325_v39 = vpop.f32.mrf.mxu0  ;;  %v373_v40 = vpop.f32.mrf.mxu1 }
  0xcb   :  { %597 = vst.msk [vmem:[%s1326_s3 + $0x138] sm:$0xff] %vm557_vm2, %v532_v37  ;;  %v326_v41 = vadd.f32 %v1001_v5, %v325_v39  ;;  %v374_v42 = vadd.f32 %v1001_v5, %v373_v40 }
  0xcc   :  { %613 = vst.msk [vmem:[%s1326_s3 + $0x1b8] sm:$0xff] %vm557_vm2, %v548_v38 }
  0xcd   :  { %v501_v43 = vmax.f32 %v326_v41, 0.0  ;;  %v517_v44 = vmax.f32 %v374_v42, 0.0 }
  0xce   :  { %v421_v45 = vpop.f32.mrf.mxu2  ;;  %v469_v46 = vpop.f32.mrf.mxu3 }
  0xcf   :  { %566 = vst.msk [vmem:[%s1326_s3 + $0x40] sm:$0xff] %vm557_vm2, %v501_v43  ;;  %v422_v47 = vadd.f32 %v1001_v5, %v421_v45  ;;  %v470_v48 = vadd.f32 %v1001_v5, %v469_v46 }
  0xd0   :  { %582 = vst.msk [vmem:[%s1326_s3 + $0xc0] sm:$0xff] %vm557_vm2, %v517_v44 }
  0xd1   :  { %v533_v49 = vmax.f32 %v422_v47, 0.0  ;;  %v549_v50 = vmax.f32 %v470_v48, 0.0 }
  0xd2   :  { %v328_v51 = vpop.f32.mrf.mxu0  ;;  %v376_v52 = vpop.f32.mrf.mxu1 }
  0xd3   :  { %598 = vst.msk [vmem:[%s1326_s3 + $0x140] sm:$0xff] %vm557_vm2, %v533_v49  ;;  %v329_v53 = vadd.f32 %v1001_v5, %v328_v51  ;;  %v377_v54 = vadd.f32 %v1001_v5, %v376_v52 }
  0xd4   :  { %614 = vst.msk [vmem:[%s1326_s3 + $0x1c0] sm:$0xff] %vm557_vm2, %v549_v50 }
  0xd5   :  { %v502_v55 = vmax.f32 %v329_v53, 0.0  ;;  %v518_v56 = vmax.f32 %v377_v54, 0.0 }
  0xd6   :  { %v424_v57 = vpop.f32.mrf.mxu2  ;;  %v472_v58 = vpop.f32.mrf.mxu3 }
  0xd7   :  { %567 = vst.msk [vmem:[%s1326_s3 + $0x48] sm:$0xff] %vm557_vm2, %v502_v55  ;;  %v425_v59 = vadd.f32 %v1001_v5, %v424_v57  ;;  %v473_v60 = vadd.f32 %v1001_v5, %v472_v58 }
  0xd8   :  { %583 = vst.msk [vmem:[%s1326_s3 + $0xc8] sm:$0xff] %vm557_vm2, %v518_v56 }
  0xd9   :  { %v534_v61 = vmax.f32 %v425_v59, 0.0  ;;  %v550_v62 = vmax.f32 %v473_v60, 0.0 }
  0xda   :  { %v331_v63 = vpop.f32.mrf.mxu0  ;;  %v379_v0 = vpop.f32.mrf.mxu1 }
  0xdb   :  { %599 = vst.msk [vmem:[%s1326_s3 + $0x148] sm:$0xff] %vm557_vm2, %v534_v61  ;;  %v332_v1 = vadd.f32 %v1001_v5, %v331_v63  ;;  %v380_v2 = vadd.f32 %v1001_v5, %v379_v0 }
  0xdc   :  { %615 = vst.msk [vmem:[%s1326_s3 + $0x1c8] sm:$0xff] %vm557_vm2, %v550_v62 }
  0xdd   :  { %v503_v3 = vmax.f32 %v332_v1, 0.0  ;;  %v519_v4 = vmax.f32 %v380_v2, 0.0 }
  0xde   :  { %v427_v6 = vpop.f32.mrf.mxu2  ;;  %v475_v7 = vpop.f32.mrf.mxu3 }
  0xdf   :  { %568 = vst.msk [vmem:[%s1326_s3 + $0x50] sm:$0xff] %vm557_vm2, %v503_v3  ;;  %v428_v8 = vadd.f32 %v1001_v5, %v427_v6  ;;  %v476_v9 = vadd.f32 %v1001_v5, %v475_v7 }
  0xe0   :  { %584 = vst.msk [vmem:[%s1326_s3 + $0xd0] sm:$0xff] %vm557_vm2, %v519_v4 }
  0xe1   :  { %v535_v10 = vmax.f32 %v428_v8, 0.0  ;;  %v551_v11 = vmax.f32 %v476_v9, 0.0 }
  0xe2   :  { %v334_v12 = vpop.f32.mrf.mxu0  ;;  %v382_v13 = vpop.f32.mrf.mxu1 }
  0xe3   :  { %600 = vst.msk [vmem:[%s1326_s3 + $0x150] sm:$0xff] %vm557_vm2, %v535_v10  ;;  %v335_v14 = vadd.f32 %v1001_v5, %v334_v12  ;;  %v383_v15 = vadd.f32 %v1001_v5, %v382_v13 }
  0xe4   :  { %616 = vst.msk [vmem:[%s1326_s3 + $0x1d0] sm:$0xff] %vm557_vm2, %v551_v11 }
  0xe5   :  { %v504_v16 = vmax.f32 %v335_v14, 0.0  ;;  %v520_v17 = vmax.f32 %v383_v15, 0.0 }
  0xe6   :  { %v430_v18 = vpop.f32.mrf.mxu2  ;;  %v478_v19 = vpop.f32.mrf.mxu3 }
  0xe7   :  { %569 = vst.msk [vmem:[%s1326_s3 + $0x58] sm:$0xff] %vm557_vm2, %v504_v16  ;;  %v431_v20 = vadd.f32 %v1001_v5, %v430_v18  ;;  %v479_v21 = vadd.f32 %v1001_v5, %v478_v19 }
  0xe8   :  { %585 = vst.msk [vmem:[%s1326_s3 + $0xd8] sm:$0xff] %vm557_vm2, %v520_v17 }
  0xe9   :  { %v536_v22 = vmax.f32 %v431_v20, 0.0  ;;  %v552_v23 = vmax.f32 %v479_v21, 0.0 }
  0xea   :  { %v337_v24 = vpop.f32.mrf.mxu0  ;;  %v385_v25 = vpop.f32.mrf.mxu1 }
  0xeb   :  { %601 = vst.msk [vmem:[%s1326_s3 + $0x158] sm:$0xff] %vm557_vm2, %v536_v22  ;;  %v338_v26 = vadd.f32 %v1001_v5, %v337_v24  ;;  %v386_v27 = vadd.f32 %v1001_v5, %v385_v25 }
  0xec   :  { %617 = vst.msk [vmem:[%s1326_s3 + $0x1d8] sm:$0xff] %vm557_vm2, %v552_v23 }
  0xed   :  { %v505_v28 = vmax.f32 %v338_v26, 0.0  ;;  %v521_v29 = vmax.f32 %v386_v27, 0.0 }
  0xee   :  { %v433_v30 = vpop.f32.mrf.mxu2  ;;  %v481_v31 = vpop.f32.mrf.mxu3 }
  0xef   :  { %570 = vst.msk [vmem:[%s1326_s3 + $0x60] sm:$0xff] %vm557_vm2, %v505_v28  ;;  %v434_v32 = vadd.f32 %v1001_v5, %v433_v30  ;;  %v482_v33 = vadd.f32 %v1001_v5, %v481_v31 }
  0xf0   :  { %586 = vst.msk [vmem:[%s1326_s3 + $0xe0] sm:$0xff] %vm557_vm2, %v521_v29 }
  0xf1   :  { %v537_v34 = vmax.f32 %v434_v32, 0.0  ;;  %v553_v35 = vmax.f32 %v482_v33, 0.0 }
  0xf2   :  { %v340_v36 = vpop.f32.mrf.mxu0  ;;  %v388_v37 = vpop.f32.mrf.mxu1 }
  0xf3   :  { %602 = vst.msk [vmem:[%s1326_s3 + $0x160] sm:$0xff] %vm557_vm2, %v537_v34  ;;  %v341_v38 = vadd.f32 %v1001_v5, %v340_v36  ;;  %v389_v39 = vadd.f32 %v1001_v5, %v388_v37 }
  0xf4   :  { %618 = vst.msk [vmem:[%s1326_s3 + $0x1e0] sm:$0xff] %vm557_vm2, %v553_v35 }
  0xf5   :  { %v506_v40 = vmax.f32 %v341_v38, 0.0  ;;  %v522_v41 = vmax.f32 %v389_v39, 0.0 }
  0xf6   :  { %v436_v42 = vpop.f32.mrf.mxu2  ;;  %v484_v43 = vpop.f32.mrf.mxu3 }
  0xf7   :  { %571 = vst.msk [vmem:[%s1326_s3 + $0x68] sm:$0xff] %vm557_vm2, %v506_v40  ;;  %v437_v44 = vadd.f32 %v1001_v5, %v436_v42  ;;  %v485_v45 = vadd.f32 %v1001_v5, %v484_v43 }
  0xf8   :  { %587 = vst.msk [vmem:[%s1326_s3 + $0xe8] sm:$0xff] %vm557_vm2, %v522_v41 }
  0xf9   :  { %v538_v46 = vmax.f32 %v437_v44, 0.0  ;;  %v554_v47 = vmax.f32 %v485_v45, 0.0 }
  0xfa   :  { %v343_v48 = vpop.f32.mrf.mxu0  ;;  %v391_v49 = vpop.f32.mrf.mxu1 }
  0xfb   :  { %603 = vst.msk [vmem:[%s1326_s3 + $0x168] sm:$0xff] %vm557_vm2, %v538_v46  ;;  %v344_v50 = vadd.f32 %v1001_v5, %v343_v48  ;;  %v392_v51 = vadd.f32 %v1001_v5, %v391_v49 }
  0xfc   :  { %619 = vst.msk [vmem:[%s1326_s3 + $0x1e8] sm:$0xff] %vm557_vm2, %v554_v47 }
  0xfd   :  { %v507_v52 = vmax.f32 %v344_v50, 0.0  ;;  %v523_v53 = vmax.f32 %v392_v51, 0.0 }
  0xfe   :  { %v439_v54 = vpop.f32.mrf.mxu2  ;;  %v487_v55 = vpop.f32.mrf.mxu3 }
  0xff   :  { %572 = vst.msk [vmem:[%s1326_s3 + $0x70] sm:$0xff] %vm557_vm2, %v507_v52  ;;  %v440_v56 = vadd.f32 %v1001_v5, %v439_v54  ;;  %v488_v57 = vadd.f32 %v1001_v5, %v487_v55 }
 0x100   :  { %588 = vst.msk [vmem:[%s1326_s3 + $0xf0] sm:$0xff] %vm557_vm2, %v523_v53 }
 0x101   :  { %v539_v58 = vmax.f32 %v440_v56, 0.0  ;;  %v555_v59 = vmax.f32 %v488_v57, 0.0 }
 0x102   :  { %v346_v60 = vpop.f32.mrf.mxu0  ;;  %v394_v61 = vpop.f32.mrf.mxu1 }
 0x103   :  { %604 = vst.msk [vmem:[%s1326_s3 + $0x170] sm:$0xff] %vm557_vm2, %v539_v58  ;;  %v347_v62 = vadd.f32 %v1001_v5, %v346_v60  ;;  %v395_v63 = vadd.f32 %v1001_v5, %v394_v61 }
 0x104   :  { %620 = vst.msk [vmem:[%s1326_s3 + $0x1f0] sm:$0xff] %vm557_vm2, %v555_v59 }
 0x105   :  { %v508_v0 = vmax.f32 %v347_v62, 0.0  ;;  %v524_v1 = vmax.f32 %v395_v63, 0.0 }
 0x106   :  { %v442_v2 = vpop.f32.mrf.mxu2  ;;  %v490_v3 = vpop.f32.mrf.mxu3 }
 0x107   :  { %573 = vst.msk [vmem:[%s1326_s3 + $0x78] sm:$0xff] %vm557_vm2, %v508_v0  ;;  %v443_v4 = vadd.f32 %v1001_v5, %v442_v2  ;;  %v491_v6 = vadd.f32 %v1001_v5, %v490_v3 }
 0x108   :  { %589 = vst.msk [vmem:[%s1326_s3 + $0xf8] sm:$0xff] %vm557_vm2, %v524_v1 }
 0x109   :  { %v540_v7 = vmax.f32 %v443_v4, 0.0  ;;  %v556_v8 = vmax.f32 %v491_v6, 0.0 }
 0x10b   :  { %605 = vst.msk [vmem:[%s1326_s3 + $0x178] sm:$0xff] %vm557_vm2, %v540_v7 }
 0x10c   :  { %621 = vst.msk [vmem:[%s1326_s3 + $0x1f8] sm:$0xff] %vm557_vm2, %v556_v8 }

// kernel: residual_block.3
= control target key start
LH: loop header
LB: loop body
LE: loop exit
PB: predicated region body
PF: predicated region fallthrough
CT: control target
= control target key end

     0   :  { %vm283_vm0 = vcmask 1043456   ;;  %vm90_vm1 = vcmask 293888   ;;  %vm624_vm2 = vcmask 31744   ;;  %s1587_s1 = inlined_call_operand.vmem [shape: f32[36,4], index: 1, kind: input, shape index: {}]   ;;  %s1588_s0 = inlined_call_operand.vmem [shape: f32[512,36], index: 0, kind: input, shape index: {}]   ;;  %s1589_s2 = inlined_call_operand.vmem [shape: f32[1,4], index: 2, kind: input, shape index: {}]   ;;  %s1590_s3 = inlined_call_operand.vmem [shape: f32[512,4], index: 3, kind: input, shape index: {}]   ;;  %s1591_s4 = inlined_call_operand.vmem [shape: f32[512,4], index: 4, kind: output, shape index: {}]  }
   0x1   :  { %v85_v0 = vld [vmem:[%s1587_s1 + $0x20] sm:$0xf]  ;;  %v84_v1 = vld [vmem:[%s1587_s1 + $0x18] sm:$0xff]  ;;  %v83_v2 = vld [vmem:[%s1587_s1 + $0x10] sm:$0xff] }
   0x2   :  { %759 = vmatpush.msk.msra.mxu2 %vm283_vm0, %v85_v0  ;;  %760 = vmatpush.msk.msra.mxu3 %vm283_vm0, %v85_v0  ;;  %v82_v3 = vld [vmem:[%s1587_s1 + $0x8] sm:$0xff]  ;;  %v81_v4 = vld [vmem:[%s1587_s1] sm:$0xff]  ;;  %v51_v13 = vld [vmem:[%s1588_s0 + $0x110] sm:$0xff] }
   0x3   :  { %693 = vmatpush.msk.msra.mxu0 %vm283_vm0, %v85_v0  ;;  %758 = vmatpush.msk.msra.mxu1 %vm283_vm0, %v85_v0  ;;  %v49_v5 = vld [vmem:[%s1588_s0 + $0x100] sm:$0xff]  ;;  %v50_v9 = vld [vmem:[%s1588_s0 + $0x108] sm:$0xff]  ;;  %v67_v14 = vld [vmem:[%s1588_s0 + $0x190] sm:$0xff] }
   0x4   :  { %762 = vmatpush.msra.mxu2 %v84_v1  ;;  %763 = vmatpush.msra.mxu3 %v84_v1  ;;  %v65_v6 = vld [vmem:[%s1588_s0 + $0x180] sm:$0xff]  ;;  %v66_v10 = vld [vmem:[%s1588_s0 + $0x188] sm:$0xff]  ;;  %v19_v15 = vld [vmem:[%s1588_s0 + $0x10] sm:$0xff] }
   0x5   :  { %299 = vmatpush.msra.mxu0 %v84_v1  ;;  %761 = vmatpush.msra.mxu1 %v84_v1  ;;  %v17_v7 = vld [vmem:[%s1588_s0] sm:$0xff]  ;;  %v18_v11 = vld [vmem:[%s1588_s0 + $0x8] sm:$0xff]  ;;  %v35_v16 = vld [vmem:[%s1588_s0 + $0x90] sm:$0xff] }
   0x6   :  { %765 = vmatpush.msra.mxu2 %v83_v2  ;;  %766 = vmatpush.msra.mxu3 %v83_v2  ;;  %v33_v8 = vld [vmem:[%s1588_s0 + $0x80] sm:$0xff]  ;;  %v34_v12 = vld [vmem:[%s1588_s0 + $0x88] sm:$0xff]  ;;  %v52_v17 = vld [vmem:[%s1588_s0 + $0x118] sm:$0xff] }
   0x7   :  { %300 = vmatpush.msra.mxu0 %v83_v2  ;;  %764 = vmatpush.msra.mxu1 %v83_v2  ;;  %v68_v18 = vld [vmem:[%s1588_s0 + $0x198] sm:$0xff]  ;;  %v53_v21 = vld [vmem:[%s1588_s0 + $0x120] sm:$0xff]  ;;  %v54_v25 = vld [vmem:[%s1588_s0 + $0x128] sm:$0xff] }
   0x8   :  { %768 = vmatpush.msra.mxu2 %v82_v3  ;;  %769 = vmatpush.msra.mxu3 %v82_v3  ;;  %v20_v19 = vld [vmem:[%s1588_s0 + $0x18] sm:$0xff]  ;;  %v69_v22 = vld [vmem:[%s1588_s0 + $0x1a0] sm:$0xff]  ;;  %v70_v26 = vld [vmem:[%s1588_s0 + $0x1a8] sm:$0xff] }
   0x9   :  { %301 = vmatpush.msra.mxu0 %v82_v3  ;;  %767 = vmatpush.msra.mxu1 %v82_v3  ;;  %v36_v20 = vld [vmem:[%s1588_s0 + $0x98] sm:$0xff]  ;;  %v21_v23 = vld [vmem:[%s1588_s0 + $0x20] sm:$0xff]  ;;  %v22_v27 = vld [vmem:[%s1588_s0 + $0x28] sm:$0xff] }
   0xa   :  { %771 = vmatpush.msra.mxu2 %v81_v4  ;;  %772 = vmatpush.msra.mxu3 %v81_v4  ;;  %v37_v24 = vld [vmem:[%s1588_s0 + $0xa0] sm:$0xff]  ;;  %v38_v28 = vld [vmem:[%s1588_s0 + $0xa8] sm:$0xff]  ;;  %v55_v29 = vld [vmem:[%s1588_s0 + $0x130] sm:$0xff] }
   0xb   :  { %726 = vmatmul.msk.f32.vlgmr.msra.gmra.mxu2 %vm90_vm1, %v49_v5  ;;  %742 = vmatmul.msk.f32.vlgmr.msra.gmra.mxu3 %vm90_vm1, %v65_v6  ;;  %v71_v30 = vld [vmem:[%s1588_s0 + $0x1b0] sm:$0xff]  ;;  %v56_v33 = vld [vmem:[%s1588_s0 + $0x138] sm:$0xff]  ;;  %v57_v37 = vld [vmem:[%s1588_s0 + $0x140] sm:$0xff] }
   0xc   :  { %302 = vmatpush.msra.mxu0 %v81_v4  ;;  %770 = vmatpush.msra.mxu1 %v81_v4  ;;  %v23_v31 = vld [vmem:[%s1588_s0 + $0x30] sm:$0xff]  ;;  %v72_v34 = vld [vmem:[%s1588_s0 + $0x1b8] sm:$0xff]  ;;  %v73_v38 = vld [vmem:[%s1588_s0 + $0x1c0] sm:$0xff] }
   0xd   :  { %694 = vmatmul.msk.f32.vlgmr.msra.gmra.mxu0 %vm90_vm1, %v17_v7  ;;  %710 = vmatmul.msk.f32.vlgmr.msra.gmra.mxu1 %vm90_vm1, %v33_v8  ;;  %v39_v32 = vld [vmem:[%s1588_s0 + $0xb0] sm:$0xff]  ;;  %v24_v35 = vld [vmem:[%s1588_s0 + $0x38] sm:$0xff]  ;;  %v25_v39 = vld [vmem:[%s1588_s0 + $0x40] sm:$0xff] }
   0xe   :  { %v40_v36 = vld [vmem:[%s1588_s0 + $0xb8] sm:$0xff]  ;;  %v41_v40 = vld [vmem:[%s1588_s0 + $0xc0] sm:$0xff]  ;;  %v58_v41 = vld [vmem:[%s1588_s0 + $0x148] sm:$0xff] }
   0xf   :  { %v74_v42 = vld [vmem:[%s1588_s0 + $0x1c8] sm:$0xff]  ;;  %v59_v45 = vld [vmem:[%s1588_s0 + $0x150] sm:$0xff]  ;;  %v60_v49 = vld [vmem:[%s1588_s0 + $0x158] sm:$0xff] }
  0x10   :  { %v26_v43 = vld [vmem:[%s1588_s0 + $0x48] sm:$0xff]  ;;  %v75_v46 = vld [vmem:[%s1588_s0 + $0x1d0] sm:$0xff]  ;;  %v76_v50 = vld [vmem:[%s1588_s0 + $0x1d8] sm:$0xff] }
  0x11   :  { %v42_v44 = vld [vmem:[%s1588_s0 + $0xc8] sm:$0xff]  ;;  %v27_v47 = vld [vmem:[%s1588_s0 + $0x50] sm:$0xff]  ;;  %v28_v51 = vld [vmem:[%s1588_s0 + $0x58] sm:$0xff] }
  0x12   :  { %v43_v48 = vld [vmem:[%s1588_s0 + $0xd0] sm:$0xff]  ;;  %v44_v52 = vld [vmem:[%s1588_s0 + $0xd8] sm:$0xff]  ;;  %v61_v53 = vld [vmem:[%s1588_s0 + $0x160] sm:$0xff] }
  0x13   :  { %727 = vmatmul.msk.f32.gmra.mxu2 %vm90_vm1, %v50_v9  ;;  %743 = vmatmul.msk.f32.gmra.mxu3 %vm90_vm1, %v66_v10  ;;  %v77_v54 = vld [vmem:[%s1588_s0 + $0x1e0] sm:$0xff]  ;;  %v62_v57 = vld [vmem:[%s1588_s0 + $0x168] sm:$0xff]  ;;  %v63_v61 = vld [vmem:[%s1588_s0 + $0x170] sm:$0xff] }
  0x14   :  { %v29_v55 = vld [vmem:[%s1588_s0 + $0x60] sm:$0xff]  ;;  %v78_v58 = vld [vmem:[%s1588_s0 + $0x1e8] sm:$0xff]  ;;  %v79_v62 = vld [vmem:[%s1588_s0 + $0x1f0] sm:$0xff] }
  0x15   :  { %695 = vmatmul.msk.f32.gmra.mxu0 %vm90_vm1, %v18_v11  ;;  %711 = vmatmul.msk.f32.gmra.mxu1 %vm90_vm1, %v34_v12  ;;  %v45_v56 = vld [vmem:[%s1588_s0 + $0xe0] sm:$0xff]  ;;  %v30_v59 = vld [vmem:[%s1588_s0 + $0x68] sm:$0xff]  ;;  %v31_v63 = vld [vmem:[%s1588_s0 + $0x70] sm:$0xff] }
  0x16   :  { %v46_v60 = vld [vmem:[%s1588_s0 + $0xe8] sm:$0xff]  ;;  %v47_v0 = vld [vmem:[%s1588_s0 + $0xf0] sm:$0xff]  ;;  %v64_v1 = vld [vmem:[%s1588_s0 + $0x178] sm:$0xff] }
  0x17   :  { %v80_v2 = vld [vmem:[%s1588_s0 + $0x1f8] sm:$0xff]  ;;  %v1073_v5 = vld [vmem:[%s1589_s2] ss:$0 sm:$0xff] }
  0x18   :  { %v32_v3 = vld [vmem:[%s1588_s0 + $0x78] sm:$0xff]  ;;  %v496_v7 = vld [vmem:[%s1590_s3] sm:$0xff] }
  0x19   :  { %v48_v4 = vld [vmem:[%s1588_s0 + $0xf8] sm:$0xff]  ;;  %v512_v9 = vld [vmem:[%s1590_s3 + $0x80] sm:$0xff] }
  0x1b   :  { %728 = vmatmul.msk.f32.gmra.mxu2 %vm90_vm1, %v51_v13  ;;  %744 = vmatmul.msk.f32.gmra.mxu3 %vm90_vm1, %v67_v14 }
  0x1d   :  { %696 = vmatmul.msk.f32.gmra.mxu0 %vm90_vm1, %v19_v15  ;;  %712 = vmatmul.msk.f32.gmra.mxu1 %vm90_vm1, %v35_v16  ;;  %v528_v15 = vld [vmem:[%s1590_s3 + $0x100] sm:$0xff] }
  0x23   :  { %729 = vmatmul.msk.f32.gmra.mxu2 %vm90_vm1, %v52_v17  ;;  %745 = vmatmul.msk.f32.gmra.mxu3 %vm90_vm1, %v68_v18  ;;  %v544_v17 = vld [vmem:[%s1590_s3 + $0x180] sm:$0xff] }
  0x25   :  { %697 = vmatmul.msk.f32.gmra.mxu0 %vm90_vm1, %v20_v19  ;;  %713 = vmatmul.msk.f32.gmra.mxu1 %vm90_vm1, %v36_v20 }
  0x2b   :  { %730 = vmatmul.msk.f32.gmra.mxu2 %vm90_vm1, %v53_v21  ;;  %746 = vmatmul.msk.f32.gmra.mxu3 %vm90_vm1, %v69_v22 }
  0x2d   :  { %698 = vmatmul.msk.f32.gmra.mxu0 %vm90_vm1, %v21_v23  ;;  %714 = vmatmul.msk.f32.gmra.mxu1 %vm90_vm1, %v37_v24  ;;  %v497_v23 = vld [vmem:[%s1590_s3 + $0x8] sm:$0xff] }
  0x33   :  { %731 = vmatmul.msk.f32.gmra.mxu2 %vm90_vm1, %v54_v25  ;;  %747 = vmatmul.msk.f32.gmra.mxu3 %vm90_vm1, %v70_v26  ;;  %v513_v25 = vld [vmem:[%s1590_s3 + $0x88] sm:$0xff] }
  0x35   :  { %699 = vmatmul.msk.f32.gmra.mxu0 %vm90_vm1, %v22_v27  ;;  %715 = vmatmul.msk.f32.gmra.mxu1 %vm90_vm1, %v38_v28 }
  0x3b   :  { %732 = vmatmul.msk.f32.gmra.mxu2 %vm90_vm1, %v55_v29  ;;  %748 = vmatmul.msk.f32.gmra.mxu3 %vm90_vm1, %v71_v30 }
  0x3d   :  { %700 = vmatmul.msk.f32.gmra.mxu0 %vm90_vm1, %v23_v31  ;;  %716 = vmatmul.msk.f32.gmra.mxu1 %vm90_vm1, %v39_v32  ;;  %v529_v31 = vld [vmem:[%s1590_s3 + $0x108] sm:$0xff] }
  0x43   :  { %733 = vmatmul.msk.f32.gmra.mxu2 %vm90_vm1, %v56_v33  ;;  %749 = vmatmul.msk.f32.gmra.mxu3 %vm90_vm1, %v72_v34  ;;  %v545_v33 = vld [vmem:[%s1590_s3 + $0x188] sm:$0xff] }
  0x45   :  { %701 = vmatmul.msk.f32.gmra.mxu0 %vm90_vm1, %v24_v35  ;;  %717 = vmatmul.msk.f32.gmra.mxu1 %vm90_vm1, %v40_v36 }
  0x4b   :  { %734 = vmatmul.msk.f32.gmra.mxu2 %vm90_vm1, %v57_v37  ;;  %750 = vmatmul.msk.f32.gmra.mxu3 %vm90_vm1, %v73_v38 }
  0x4d   :  { %702 = vmatmul.msk.f32.gmra.mxu0 %vm90_vm1, %v25_v39  ;;  %718 = vmatmul.msk.f32.gmra.mxu1 %vm90_vm1, %v41_v40  ;;  %v498_v39 = vld [vmem:[%s1590_s3 + $0x10] sm:$0xff] }
  0x53   :  { %735 = vmatmul.msk.f32.gmra.mxu2 %vm90_vm1, %v58_v41  ;;  %751 = vmatmul.msk.f32.gmra.mxu3 %vm90_vm1, %v74_v42  ;;  %v514_v41 = vld [vmem:[%s1590_s3 + $0x90] sm:$0xff] }
  0x55   :  { %703 = vmatmul.msk.f32.gmra.mxu0 %vm90_vm1, %v26_v43  ;;  %719 = vmatmul.msk.f32.gmra.mxu1 %vm90_vm1, %v42_v44 }
  0x5b   :  { %736 = vmatmul.msk.f32.gmra.mxu2 %vm90_vm1, %v59_v45  ;;  %752 = vmatmul.msk.f32.gmra.mxu3 %vm90_vm1, %v75_v46 }
  0x5d   :  { %704 = vmatmul.msk.f32.gmra.mxu0 %vm90_vm1, %v27_v47  ;;  %720 = vmatmul.msk.f32.gmra.mxu1 %vm90_vm1, %v43_v48  ;;  %v530_v47 = vld [vmem:[%s1590_s3 + $0x110] sm:$0xff] }
  0x63   :  { %737 = vmatmul.msk.f32.gmra.mxu2 %vm90_vm1, %v60_v49  ;;  %753 = vmatmul.msk.f32.gmra.mxu3 %vm90_vm1, %v76_v50  ;;  %v546_v49 = vld [vmem:[%s1590_s3 + $0x190] sm:$0xff] }
  0x65   :  { %705 = vmatmul.msk.f32.gmra.mxu0 %vm90_vm1, %v28_v51  ;;  %721 = vmatmul.msk.f32.gmra.mxu1 %vm90_vm1, %v44_v52 }
  0x6b   :  { %738 = vmatmul.msk.f32.gmra.mxu2 %vm90_vm1, %v61_v53  ;;  %754 = vmatmul.msk.f32.gmra.mxu3 %vm90_vm1, %v77_v54 }
  0x6d   :  { %706 = vmatmul.msk.f32.gmra.mxu0 %vm90_vm1, %v29_v55  ;;  %722 = vmatmul.msk.f32.gmra.mxu1 %vm90_vm1, %v45_v56  ;;  %v499_v55 = vld [vmem:[%s1590_s3 + $0x18] sm:$0xff] }
  0x73   :  { %739 = vmatmul.msk.f32.gmra.mxu2 %vm90_vm1, %v62_v57  ;;  %755 = vmatmul.msk.f32.gmra.mxu3 %vm90_vm1, %v78_v58  ;;  %v515_v57 = vld [vmem:[%s1590_s3 + $0x98] sm:$0xff] }
  0x75   :  { %707 = vmatmul.msk.f32.gmra.mxu0 %vm90_vm1, %v30_v59  ;;  %723 = vmatmul.msk.f32.gmra.mxu1 %vm90_vm1, %v46_v60 }
  0x7b   :  { %740 = vmatmul.msk.f32.gmra.mxu2 %vm90_vm1, %v63_v61  ;;  %756 = vmatmul.msk.f32.gmra.mxu3 %vm90_vm1, %v79_v62 }
  0x7d   :  { %708 = vmatmul.msk.f32.gmra.mxu0 %vm90_vm1, %v31_v63  ;;  %724 = vmatmul.msk.f32.gmra.mxu1 %vm90_vm1, %v47_v0  ;;  %v531_v63 = vld [vmem:[%s1590_s3 + $0x118] sm:$0xff] }
  0x83   :  { %741 = vmatmul.msk.f32.gmra.mxu2 %vm90_vm1, %v64_v1  ;;  %757 = vmatmul.msk.f32.gmra.mxu3 %vm90_vm1, %v80_v2  ;;  %v547_v1 = vld [vmem:[%s1590_s3 + $0x198] sm:$0xff] }
  0x85   :  { %709 = vmatmul.msk.f32.gmra.mxu0 %vm90_vm1, %v32_v3  ;;  %725 = vmatmul.msk.f32.gmra.mxu1 %vm90_vm1, %v48_v4 }
  0x8a   :  { %v304_v6 = vpop.f32.mrf.mxu0  ;;  %v352_v8 = vpop.f32.mrf.mxu1 }
  0x8b   :  { %v305_v10 = vadd.f32 %v1073_v5, %v304_v6  ;;  %v353_v11 = vadd.f32 %v1073_v5, %v352_v8  ;;  %v500_v8 = vld [vmem:[%s1590_s3 + $0x20] sm:$0xff] }
  0x8d   :  { %v560_v12 = vadd.f32 %v496_v7, %v305_v10  ;;  %v576_v13 = vadd.f32 %v512_v9, %v353_v11  ;;  %v516_v10 = vld [vmem:[%s1590_s3 + $0xa0] sm:$0xff] }
  0x8e   :  { %v400_v14 = vpop.f32.mrf.mxu2  ;;  %v448_v16 = vpop.f32.mrf.mxu3 }
  0x8f   :  { %625 = vst.msk [vmem:[%s1591_s4] sm:$0xff] %vm624_vm2, %v560_v12  ;;  %v401_v18 = vadd.f32 %v1073_v5, %v400_v14  ;;  %v449_v19 = vadd.f32 %v1073_v5, %v448_v16  ;;  %v532_v16 = vld [vmem:[%s1590_s3 + $0x120] sm:$0xff] }
  0x90   :  { %641 = vst.msk [vmem:[%s1591_s4 + $0x80] sm:$0xff] %vm624_vm2, %v576_v13 }
  0x91   :  { %v592_v20 = vadd.f32 %v528_v15, %v401_v18  ;;  %v608_v21 = vadd.f32 %v544_v17, %v449_v19  ;;  %v548_v18 = vld [vmem:[%s1590_s3 + $0x1a0] sm:$0xff] }
  0x92   :  { %v307_v22 = vpop.f32.mrf.mxu0  ;;  %v355_v24 = vpop.f32.mrf.mxu1 }
  0x93   :  { %657 = vst.msk [vmem:[%s1591_s4 + $0x100] sm:$0xff] %vm624_vm2, %v592_v20  ;;  %v308_v26 = vadd.f32 %v1073_v5, %v307_v22  ;;  %v356_v27 = vadd.f32 %v1073_v5, %v355_v24  ;;  %v501_v24 = vld [vmem:[%s1590_s3 + $0x28] sm:$0xff] }
  0x94   :  { %673 = vst.msk [vmem:[%s1591_s4 + $0x180] sm:$0xff] %vm624_vm2, %v608_v21 }
  0x95   :  { %v561_v28 = vadd.f32 %v497_v23, %v308_v26  ;;  %v577_v29 = vadd.f32 %v513_v25, %v356_v27  ;;  %v517_v26 = vld [vmem:[%s1590_s3 + $0xa8] sm:$0xff] }
  0x96   :  { %v403_v30 = vpop.f32.mrf.mxu2  ;;  %v451_v32 = vpop.f32.mrf.mxu3 }
  0x97   :  { %626 = vst.msk [vmem:[%s1591_s4 + $0x8] sm:$0xff] %vm624_vm2, %v561_v28  ;;  %v404_v34 = vadd.f32 %v1073_v5, %v403_v30  ;;  %v452_v35 = vadd.f32 %v1073_v5, %v451_v32  ;;  %v533_v32 = vld [vmem:[%s1590_s3 + $0x128] sm:$0xff] }
  0x98   :  { %642 = vst.msk [vmem:[%s1591_s4 + $0x88] sm:$0xff] %vm624_vm2, %v577_v29 }
  0x99   :  { %v593_v36 = vadd.f32 %v529_v31, %v404_v34  ;;  %v609_v37 = vadd.f32 %v545_v33, %v452_v35  ;;  %v549_v34 = vld [vmem:[%s1590_s3 + $0x1a8] sm:$0xff] }
  0x9a   :  { %v310_v38 = vpop.f32.mrf.mxu0  ;;  %v358_v40 = vpop.f32.mrf.mxu1 }
  0x9b   :  { %658 = vst.msk [vmem:[%s1591_s4 + $0x108] sm:$0xff] %vm624_vm2, %v593_v36  ;;  %v311_v42 = vadd.f32 %v1073_v5, %v310_v38  ;;  %v359_v43 = vadd.f32 %v1073_v5, %v358_v40  ;;  %v502_v40 = vld [vmem:[%s1590_s3 + $0x30] sm:$0xff] }
  0x9c   :  { %674 = vst.msk [vmem:[%s1591_s4 + $0x188] sm:$0xff] %vm624_vm2, %v609_v37 }
  0x9d   :  { %v562_v44 = vadd.f32 %v498_v39, %v311_v42  ;;  %v578_v45 = vadd.f32 %v514_v41, %v359_v43  ;;  %v518_v42 = vld [vmem:[%s1590_s3 + $0xb0] sm:$0xff] }
  0x9e   :  { %v406_v46 = vpop.f32.mrf.mxu2  ;;  %v454_v48 = vpop.f32.mrf.mxu3 }
  0x9f   :  { %627 = vst.msk [vmem:[%s1591_s4 + $0x10] sm:$0xff] %vm624_vm2, %v562_v44  ;;  %v407_v50 = vadd.f32 %v1073_v5, %v406_v46  ;;  %v455_v51 = vadd.f32 %v1073_v5, %v454_v48  ;;  %v534_v48 = vld [vmem:[%s1590_s3 + $0x130] sm:$0xff] }
  0xa0   :  { %643 = vst.msk [vmem:[%s1591_s4 + $0x90] sm:$0xff] %vm624_vm2, %v578_v45 }
  0xa1   :  { %v594_v52 = vadd.f32 %v530_v47, %v407_v50  ;;  %v610_v53 = vadd.f32 %v546_v49, %v455_v51  ;;  %v550_v50 = vld [vmem:[%s1590_s3 + $0x1b0] sm:$0xff] }
  0xa2   :  { %v313_v54 = vpop.f32.mrf.mxu0  ;;  %v361_v56 = vpop.f32.mrf.mxu1 }
  0xa3   :  { %659 = vst.msk [vmem:[%s1591_s4 + $0x110] sm:$0xff] %vm624_vm2, %v594_v52  ;;  %v314_v58 = vadd.f32 %v1073_v5, %v313_v54  ;;  %v362_v59 = vadd.f32 %v1073_v5, %v361_v56  ;;  %v503_v56 = vld [vmem:[%s1590_s3 + $0x38] sm:$0xff] }
  0xa4   :  { %675 = vst.msk [vmem:[%s1591_s4 + $0x190] sm:$0xff] %vm624_vm2, %v610_v53 }
  0xa5   :  { %v563_v60 = vadd.f32 %v499_v55, %v314_v58  ;;  %v579_v61 = vadd.f32 %v515_v57, %v362_v59  ;;  %v519_v58 = vld [vmem:[%s1590_s3 + $0xb8] sm:$0xff] }
  0xa6   :  { %v409_v62 = vpop.f32.mrf.mxu2  ;;  %v457_v0 = vpop.f32.mrf.mxu3 }
  0xa7   :  { %628 = vst.msk [vmem:[%s1591_s4 + $0x18] sm:$0xff] %vm624_vm2, %v563_v60  ;;  %v410_v2 = vadd.f32 %v1073_v5, %v409_v62  ;;  %v458_v3 = vadd.f32 %v1073_v5, %v457_v0  ;;  %v535_v0 = vld [vmem:[%s1590_s3 + $0x138] sm:$0xff] }
  0xa8   :  { %644 = vst.msk [vmem:[%s1591_s4 + $0x98] sm:$0xff] %vm624_vm2, %v579_v61 }
  0xa9   :  { %v595_v4 = vadd.f32 %v531_v63, %v410_v2  ;;  %v611_v6 = vadd.f32 %v547_v1, %v458_v3  ;;  %v551_v2 = vld [vmem:[%s1590_s3 + $0x1b8] sm:$0xff] }
  0xaa   :  { %v316_v7 = vpop.f32.mrf.mxu0  ;;  %v364_v9 = vpop.f32.mrf.mxu1 }
  0xab   :  { %660 = vst.msk [vmem:[%s1591_s4 + $0x118] sm:$0xff] %vm624_vm2, %v595_v4  ;;  %v317_v11 = vadd.f32 %v1073_v5, %v316_v7  ;;  %v365_v12 = vadd.f32 %v1073_v5, %v364_v9  ;;  %v504_v9 = vld [vmem:[%s1590_s3 + $0x40] sm:$0xff] }
  0xac   :  { %676 = vst.msk [vmem:[%s1591_s4 + $0x198] sm:$0xff] %vm624_vm2, %v611_v6 }
  0xad   :  { %v564_v13 = vadd.f32 %v500_v8, %v317_v11  ;;  %v580_v14 = vadd.f32 %v516_v10, %v365_v12  ;;  %v520_v11 = vld [vmem:[%s1590_s3 + $0xc0] sm:$0xff] }
  0xae   :  { %v412_v15 = vpop.f32.mrf.mxu2  ;;  %v460_v17 = vpop.f32.mrf.mxu3 }
  0xaf   :  { %629 = vst.msk [vmem:[%s1591_s4 + $0x20] sm:$0xff] %vm624_vm2, %v564_v13  ;;  %v413_v19 = vadd.f32 %v1073_v5, %v412_v15  ;;  %v461_v20 = vadd.f32 %v1073_v5, %v460_v17  ;;  %v536_v17 = vld [vmem:[%s1590_s3 + $0x140] sm:$0xff] }
  0xb0   :  { %645 = vst.msk [vmem:[%s1591_s4 + $0xa0] sm:$0xff] %vm624_vm2, %v580_v14 }
  0xb1   :  { %v596_v21 = vadd.f32 %v532_v16, %v413_v19  ;;  %v612_v22 = vadd.f32 %v548_v18, %v461_v20  ;;  %v552_v19 = vld [vmem:[%s1590_s3 + $0x1c0] sm:$0xff] }
  0xb2   :  { %v319_v23 = vpop.f32.mrf.mxu0  ;;  %v367_v25 = vpop.f32.mrf.mxu1 }
  0xb3   :  { %661 = vst.msk [vmem:[%s1591_s4 + $0x120] sm:$0xff] %vm624_vm2, %v596_v21  ;;  %v320_v27 = vadd.f32 %v1073_v5, %v319_v23  ;;  %v368_v28 = vadd.f32 %v1073_v5, %v367_v25  ;;  %v505_v25 = vld [vmem:[%s1590_s3 + $0x48] sm:$0xff] }
  0xb4   :  { %677 = vst.msk [vmem:[%s1591_s4 + $0x1a0] sm:$0xff] %vm624_vm2, %v612_v22 }
  0xb5   :  { %v565_v29 = vadd.f32 %v501_v24, %v320_v27  ;;  %v581_v30 = vadd.f32 %v517_v26, %v368_v28  ;;  %v521_v27 = vld [vmem:[%s1590_s3 + $0xc8] sm:$0xff] }
  0xb6   :  { %v415_v31 = vpop.f32.mrf.mxu2  ;;  %v463_v33 = vpop.f32.mrf.mxu3 }
  0xb7   :  { %630 = vst.msk [vmem:[%s1591_s4 + $0x28] sm:$0xff] %vm624_vm2, %v565_v29  ;;  %v416_v35 = vadd.f32 %v1073_v5, %v415_v31  ;;  %v464_v36 = vadd.f32 %v1073_v5, %v463_v33  ;;  %v537_v33 = vld [vmem:[%s1590_s3 + $0x148] sm:$0xff] }
  0xb8   :  { %646 = vst.msk [vmem:[%s1591_s4 + $0xa8] sm:$0xff] %vm624_vm2, %v581_v30 }
  0xb9   :  { %v597_v37 = vadd.f32 %v533_v32, %v416_v35  ;;  %v613_v38 = vadd.f32 %v549_v34, %v464_v36  ;;  %v553_v35 = vld [vmem:[%s1590_s3 + $0x1c8] sm:$0xff] }
  0xba   :  { %v322_v39 = vpop.f32.mrf.mxu0  ;;  %v370_v41 = vpop.f32.mrf.mxu1 }
  0xbb   :  { %662 = vst.msk [vmem:[%s1591_s4 + $0x128] sm:$0xff] %vm624_vm2, %v597_v37  ;;  %v323_v43 = vadd.f32 %v1073_v5, %v322_v39  ;;  %v371_v44 = vadd.f32 %v1073_v5, %v370_v41  ;;  %v506_v41 = vld [vmem:[%s1590_s3 + $0x50] sm:$0xff] }
  0xbc   :  { %678 = vst.msk [vmem:[%s1591_s4 + $0x1a8] sm:$0xff] %vm624_vm2, %v613_v38 }
  0xbd   :  { %v566_v45 = vadd.f32 %v502_v40, %v323_v43  ;;  %v582_v46 = vadd.f32 %v518_v42, %v371_v44  ;;  %v522_v43 = vld [vmem:[%s1590_s3 + $0xd0] sm:$0xff] }
  0xbe   :  { %v418_v47 = vpop.f32.mrf.mxu2  ;;  %v466_v49 = vpop.f32.mrf.mxu3 }
  0xbf   :  { %631 = vst.msk [vmem:[%s1591_s4 + $0x30] sm:$0xff] %vm624_vm2, %v566_v45  ;;  %v419_v51 = vadd.f32 %v1073_v5, %v418_v47  ;;  %v467_v52 = vadd.f32 %v1073_v5, %v466_v49  ;;  %v538_v49 = vld [vmem:[%s1590_s3 + $0x150] sm:$0xff] }
  0xc0   :  { %647 = vst.msk [vmem:[%s1591_s4 + $0xb0] sm:$0xff] %vm624_vm2, %v582_v46 }
  0xc1   :  { %v598_v53 = vadd.f32 %v534_v48, %v419_v51  ;;  %v614_v54 = vadd.f32 %v550_v50, %v467_v52  ;;  %v554_v51 = vld [vmem:[%s1590_s3 + $0x1d0] sm:$0xff] }
  0xc2   :  { %v325_v55 = vpop.f32.mrf.mxu0  ;;  %v373_v57 = vpop.f32.mrf.mxu1 }
  0xc3   :  { %663 = vst.msk [vmem:[%s1591_s4 + $0x130] sm:$0xff] %vm624_vm2, %v598_v53  ;;  %v326_v59 = vadd.f32 %v1073_v5, %v325_v55  ;;  %v374_v60 = vadd.f32 %v1073_v5, %v373_v57  ;;  %v507_v57 = vld [vmem:[%s1590_s3 + $0x58] sm:$0xff] }
  0xc4   :  { %679 = vst.msk [vmem:[%s1591_s4 + $0x1b0] sm:$0xff] %vm624_vm2, %v614_v54 }
  0xc5   :  { %v567_v61 = vadd.f32 %v503_v56, %v326_v59  ;;  %v583_v62 = vadd.f32 %v519_v58, %v374_v60  ;;  %v523_v59 = vld [vmem:[%s1590_s3 + $0xd8] sm:$0xff] }
  0xc6   :  { %v421_v63 = vpop.f32.mrf.mxu2  ;;  %v469_v1 = vpop.f32.mrf.mxu3 }
  0xc7   :  { %632 = vst.msk [vmem:[%s1591_s4 + $0x38] sm:$0xff] %vm624_vm2, %v567_v61  ;;  %v422_v3 = vadd.f32 %v1073_v5, %v421_v63  ;;  %v470_v4 = vadd.f32 %v1073_v5, %v469_v1  ;;  %v539_v1 = vld [vmem:[%s1590_s3 + $0x158] sm:$0xff] }
  0xc8   :  { %648 = vst.msk [vmem:[%s1591_s4 + $0xb8] sm:$0xff] %vm624_vm2, %v583_v62 }
  0xc9   :  { %v599_v6 = vadd.f32 %v535_v0, %v422_v3  ;;  %v615_v7 = vadd.f32 %v551_v2, %v470_v4  ;;  %v555_v3 = vld [vmem:[%s1590_s3 + $0x1d8] sm:$0xff] }
  0xca   :  { %v328_v8 = vpop.f32.mrf.mxu0  ;;  %v376_v10 = vpop.f32.mrf.mxu1 }
  0xcb   :  { %664 = vst.msk [vmem:[%s1591_s4 + $0x138] sm:$0xff] %vm624_vm2, %v599_v6  ;;  %v329_v12 = vadd.f32 %v1073_v5, %v328_v8  ;;  %v377_v13 = vadd.f32 %v1073_v5, %v376_v10  ;;  %v508_v10 = vld [vmem:[%s1590_s3 + $0x60] sm:$0xff] }
  0xcc   :  { %680 = vst.msk [vmem:[%s1591_s4 + $0x1b8] sm:$0xff] %vm624_vm2, %v615_v7 }
  0xcd   :  { %v568_v14 = vadd.f32 %v504_v9, %v329_v12  ;;  %v584_v15 = vadd.f32 %v520_v11, %v377_v13  ;;  %v524_v12 = vld [vmem:[%s1590_s3 + $0xe0] sm:$0xff] }
  0xce   :  { %v424_v16 = vpop.f32.mrf.mxu2  ;;  %v472_v18 = vpop.f32.mrf.mxu3 }
  0xcf   :  { %633 = vst.msk [vmem:[%s1591_s4 + $0x40] sm:$0xff] %vm624_vm2, %v568_v14  ;;  %v425_v20 = vadd.f32 %v1073_v5, %v424_v16  ;;  %v473_v21 = vadd.f32 %v1073_v5, %v472_v18  ;;  %v540_v18 = vld [vmem:[%s1590_s3 + $0x160] sm:$0xff] }
  0xd0   :  { %649 = vst.msk [vmem:[%s1591_s4 + $0xc0] sm:$0xff] %vm624_vm2, %v584_v15 }
  0xd1   :  { %v600_v22 = vadd.f32 %v536_v17, %v425_v20  ;;  %v616_v23 = vadd.f32 %v552_v19, %v473_v21  ;;  %v556_v20 = vld [vmem:[%s1590_s3 + $0x1e0] sm:$0xff] }
  0xd2   :  { %v331_v24 = vpop.f32.mrf.mxu0  ;;  %v379_v26 = vpop.f32.mrf.mxu1 }
  0xd3   :  { %665 = vst.msk [vmem:[%s1591_s4 + $0x140] sm:$0xff] %vm624_vm2, %v600_v22  ;;  %v332_v28 = vadd.f32 %v1073_v5, %v331_v24  ;;  %v380_v29 = vadd.f32 %v1073_v5, %v379_v26  ;;  %v509_v26 = vld [vmem:[%s1590_s3 + $0x68] sm:$0xff] }
  0xd4   :  { %681 = vst.msk [vmem:[%s1591_s4 + $0x1c0] sm:$0xff] %vm624_vm2, %v616_v23 }
  0xd5   :  { %v569_v30 = vadd.f32 %v505_v25, %v332_v28  ;;  %v585_v31 = vadd.f32 %v521_v27, %v380_v29  ;;  %v525_v28 = vld [vmem:[%s1590_s3 + $0xe8] sm:$0xff] }
  0xd6   :  { %v427_v32 = vpop.f32.mrf.mxu2  ;;  %v475_v34 = vpop.f32.mrf.mxu3 }
  0xd7   :  { %634 = vst.msk [vmem:[%s1591_s4 + $0x48] sm:$0xff] %vm624_vm2, %v569_v30  ;;  %v428_v36 = vadd.f32 %v1073_v5, %v427_v32  ;;  %v476_v37 = vadd.f32 %v1073_v5, %v475_v34  ;;  %v541_v34 = vld [vmem:[%s1590_s3 + $0x168] sm:$0xff] }
  0xd8   :  { %650 = vst.msk [vmem:[%s1591_s4 + $0xc8] sm:$0xff] %vm624_vm2, %v585_v31 }
  0xd9   :  { %v601_v38 = vadd.f32 %v537_v33, %v428_v36  ;;  %v617_v39 = vadd.f32 %v553_v35, %v476_v37  ;;  %v557_v36 = vld [vmem:[%s1590_s3 + $0x1e8] sm:$0xff] }
  0xda   :  { %v334_v40 = vpop.f32.mrf.mxu0  ;;  %v382_v42 = vpop.f32.mrf.mxu1 }
  0xdb   :  { %666 = vst.msk [vmem:[%s1591_s4 + $0x148] sm:$0xff] %vm624_vm2, %v601_v38  ;;  %v335_v44 = vadd.f32 %v1073_v5, %v334_v40  ;;  %v383_v45 = vadd.f32 %v1073_v5, %v382_v42  ;;  %v510_v42 = vld [vmem:[%s1590_s3 + $0x70] sm:$0xff] }
  0xdc   :  { %682 = vst.msk [vmem:[%s1591_s4 + $0x1c8] sm:$0xff] %vm624_vm2, %v617_v39 }
  0xdd   :  { %v570_v46 = vadd.f32 %v506_v41, %v335_v44  ;;  %v586_v47 = vadd.f32 %v522_v43, %v383_v45  ;;  %v526_v44 = vld [vmem:[%s1590_s3 + $0xf0] sm:$0xff] }
  0xde   :  { %v430_v48 = vpop.f32.mrf.mxu2  ;;  %v478_v50 = vpop.f32.mrf.mxu3 }
  0xdf   :  { %635 = vst.msk [vmem:[%s1591_s4 + $0x50] sm:$0xff] %vm624_vm2, %v570_v46  ;;  %v431_v52 = vadd.f32 %v1073_v5, %v430_v48  ;;  %v479_v53 = vadd.f32 %v1073_v5, %v478_v50  ;;  %v542_v50 = vld [vmem:[%s1590_s3 + $0x170] sm:$0xff] }
  0xe0   :  { %651 = vst.msk [vmem:[%s1591_s4 + $0xd0] sm:$0xff] %vm624_vm2, %v586_v47 }
  0xe1   :  { %v602_v54 = vadd.f32 %v538_v49, %v431_v52  ;;  %v618_v55 = vadd.f32 %v554_v51, %v479_v53  ;;  %v558_v52 = vld [vmem:[%s1590_s3 + $0x1f0] sm:$0xff] }
  0xe2   :  { %v337_v56 = vpop.f32.mrf.mxu0  ;;  %v385_v58 = vpop.f32.mrf.mxu1 }
  0xe3   :  { %667 = vst.msk [vmem:[%s1591_s4 + $0x150] sm:$0xff] %vm624_vm2, %v602_v54  ;;  %v338_v60 = vadd.f32 %v1073_v5, %v337_v56  ;;  %v386_v61 = vadd.f32 %v1073_v5, %v385_v58  ;;  %v511_v58 = vld [vmem:[%s1590_s3 + $0x78] sm:$0xff] }
  0xe4   :  { %683 = vst.msk [vmem:[%s1591_s4 + $0x1d0] sm:$0xff] %vm624_vm2, %v618_v55 }
  0xe5   :  { %v571_v62 = vadd.f32 %v507_v57, %v338_v60  ;;  %v587_v63 = vadd.f32 %v523_v59, %v386_v61  ;;  %v527_v60 = vld [vmem:[%s1590_s3 + $0xf8] sm:$0xff] }
  0xe6   :  { %v433_v0 = vpop.f32.mrf.mxu2  ;;  %v481_v2 = vpop.f32.mrf.mxu3 }
  0xe7   :  { %636 = vst.msk [vmem:[%s1591_s4 + $0x58] sm:$0xff] %vm624_vm2, %v571_v62  ;;  %v434_v4 = vadd.f32 %v1073_v5, %v433_v0  ;;  %v482_v6 = vadd.f32 %v1073_v5, %v481_v2  ;;  %v543_v2 = vld [vmem:[%s1590_s3 + $0x178] sm:$0xff] }
  0xe8   :  { %652 = vst.msk [vmem:[%s1591_s4 + $0xd8] sm:$0xff] %vm624_vm2, %v587_v63 }
  0xe9   :  { %v603_v7 = vadd.f32 %v539_v1, %v434_v4  ;;  %v619_v8 = vadd.f32 %v555_v3, %v482_v6  ;;  %v559_v4 = vld [vmem:[%s1590_s3 + $0x1f8] sm:$0xff] }
  0xea   :  { %v340_v9 = vpop.f32.mrf.mxu0  ;;  %v388_v11 = vpop.f32.mrf.mxu1 }
  0xeb   :  { %668 = vst.msk [vmem:[%s1591_s4 + $0x158] sm:$0xff] %vm624_vm2, %v603_v7  ;;  %v341_v13 = vadd.f32 %v1073_v5, %v340_v9  ;;  %v389_v14 = vadd.f32 %v1073_v5, %v388_v11 }
  0xec   :  { %684 = vst.msk [vmem:[%s1591_s4 + $0x1d8] sm:$0xff] %vm624_vm2, %v619_v8 }
  0xed   :  { %v572_v15 = vadd.f32 %v508_v10, %v341_v13  ;;  %v588_v16 = vadd.f32 %v524_v12, %v389_v14 }
  0xee   :  { %v436_v17 = vpop.f32.mrf.mxu2  ;;  %v484_v19 = vpop.f32.mrf.mxu3 }
  0xef   :  { %637 = vst.msk [vmem:[%s1591_s4 + $0x60] sm:$0xff] %vm624_vm2, %v572_v15  ;;  %v437_v21 = vadd.f32 %v1073_v5, %v436_v17  ;;  %v485_v22 = vadd.f32 %v1073_v5, %v484_v19 }
  0xf0   :  { %653 = vst.msk [vmem:[%s1591_s4 + $0xe0] sm:$0xff] %vm624_vm2, %v588_v16 }
  0xf1   :  { %v604_v23 = vadd.f32 %v540_v18, %v437_v21  ;;  %v620_v24 = vadd.f32 %v556_v20, %v485_v22 }
  0xf2   :  { %v343_v25 = vpop.f32.mrf.mxu0  ;;  %v391_v27 = vpop.f32.mrf.mxu1 }
  0xf3   :  { %669 = vst.msk [vmem:[%s1591_s4 + $0x160] sm:$0xff] %vm624_vm2, %v604_v23  ;;  %v344_v29 = vadd.f32 %v1073_v5, %v343_v25  ;;  %v392_v30 = vadd.f32 %v1073_v5, %v391_v27 }
  0xf4   :  { %685 = vst.msk [vmem:[%s1591_s4 + $0x1e0] sm:$0xff] %vm624_vm2, %v620_v24 }
  0xf5   :  { %v573_v31 = vadd.f32 %v509_v26, %v344_v29  ;;  %v589_v32 = vadd.f32 %v525_v28, %v392_v30 }
  0xf6   :  { %v439_v33 = vpop.f32.mrf.mxu2  ;;  %v487_v35 = vpop.f32.mrf.mxu3 }
  0xf7   :  { %638 = vst.msk [vmem:[%s1591_s4 + $0x68] sm:$0xff] %vm624_vm2, %v573_v31  ;;  %v440_v37 = vadd.f32 %v1073_v5, %v439_v33  ;;  %v488_v38 = vadd.f32 %v1073_v5, %v487_v35 }
  0xf8   :  { %654 = vst.msk [vmem:[%s1591_s4 + $0xe8] sm:$0xff] %vm624_vm2, %v589_v32 }
  0xf9   :  { %v605_v39 = vadd.f32 %v541_v34, %v440_v37  ;;  %v621_v40 = vadd.f32 %v557_v36, %v488_v38 }
  0xfa   :  { %v346_v41 = vpop.f32.mrf.mxu0  ;;  %v394_v43 = vpop.f32.mrf.mxu1 }
  0xfb   :  { %670 = vst.msk [vmem:[%s1591_s4 + $0x168] sm:$0xff] %vm624_vm2, %v605_v39  ;;  %v347_v45 = vadd.f32 %v1073_v5, %v346_v41  ;;  %v395_v46 = vadd.f32 %v1073_v5, %v394_v43 }
  0xfc   :  { %686 = vst.msk [vmem:[%s1591_s4 + $0x1e8] sm:$0xff] %vm624_vm2, %v621_v40 }
  0xfd   :  { %v574_v47 = vadd.f32 %v510_v42, %v347_v45  ;;  %v590_v48 = vadd.f32 %v526_v44, %v395_v46 }
  0xfe   :  { %v442_v49 = vpop.f32.mrf.mxu2  ;;  %v490_v51 = vpop.f32.mrf.mxu3 }
  0xff   :  { %639 = vst.msk [vmem:[%s1591_s4 + $0x70] sm:$0xff] %vm624_vm2, %v574_v47  ;;  %v443_v53 = vadd.f32 %v1073_v5, %v442_v49  ;;  %v491_v54 = vadd.f32 %v1073_v5, %v490_v51 }
 0x100   :  { %655 = vst.msk [vmem:[%s1591_s4 + $0xf0] sm:$0xff] %vm624_vm2, %v590_v48 }
 0x101   :  { %v606_v55 = vadd.f32 %v542_v50, %v443_v53  ;;  %v622_v56 = vadd.f32 %v558_v52, %v491_v54 }
 0x102   :  { %v349_v57 = vpop.f32.mrf.mxu0  ;;  %v397_v59 = vpop.f32.mrf.mxu1 }
 0x103   :  { %671 = vst.msk [vmem:[%s1591_s4 + $0x170] sm:$0xff] %vm624_vm2, %v606_v55  ;;  %v350_v61 = vadd.f32 %v1073_v5, %v349_v57  ;;  %v398_v62 = vadd.f32 %v1073_v5, %v397_v59 }
 0x104   :  { %687 = vst.msk [vmem:[%s1591_s4 + $0x1f0] sm:$0xff] %vm624_vm2, %v622_v56 }
 0x105   :  { %v575_v63 = vadd.f32 %v511_v58, %v350_v61  ;;  %v591_v0 = vadd.f32 %v527_v60, %v398_v62 }
 0x106   :  { %v445_v1 = vpop.f32.mrf.mxu2  ;;  %v493_v3 = vpop.f32.mrf.mxu3 }
 0x107   :  { %640 = vst.msk [vmem:[%s1591_s4 + $0x78] sm:$0xff] %vm624_vm2, %v575_v63  ;;  %v446_v6 = vadd.f32 %v1073_v5, %v445_v1  ;;  %v494_v7 = vadd.f32 %v1073_v5, %v493_v3 }
 0x108   :  { %656 = vst.msk [vmem:[%s1591_s4 + $0xf8] sm:$0xff] %vm624_vm2, %v591_v0 }
 0x109   :  { %v607_v8 = vadd.f32 %v543_v2, %v446_v6  ;;  %v623_v9 = vadd.f32 %v559_v4, %v494_v7 }
 0x10b   :  { %672 = vst.msk [vmem:[%s1591_s4 + $0x178] sm:$0xff] %vm624_vm2, %v607_v8 }
 0x10c   :  { %688 = vst.msk [vmem:[%s1591_s4 + $0x1f8] sm:$0xff] %vm624_vm2, %v623_v9 }

</bundles_post_ra>
